<compile_context>
chip_gen: v5e
topology: v5e:2x2
jax: 0.10.0
libtpu: 0.0.40
codegen_flags: <defaults>
</compile_context>

<pallas_src>
import functools

import jax
import jax.numpy as jnp
from jax.experimental import pallas as pl
from jax.experimental.pallas import tpu as pltpu


def _round_up(n, m):
    return ((n + m - 1) // m) * m


def _cdiv(a, b):
    return (a + b - 1) // b


# Probe once whether this jax version's BlockSpec accepts pipeline_mode.
try:
    pl.BlockSpec((8, 128), lambda i: (0, 0), pipeline_mode=pl.Buffered(1))
    _SUPPORTS_BUFFERED = True
except Exception:  # pragma: no cover - older jax
    _SUPPORTS_BUFFERED = False


def _const_spec(shape, buffered):
    """BlockSpec for a weight/bias that is identical for every grid step."""
    rank = len(shape)
    idx = lambda i, _r=rank: (0,) * _r
    if buffered:
        # Constant index_map -> no need for double buffering; halve VMEM use.
        return pl.BlockSpec(shape, idx, pipeline_mode=pl.Buffered(1))
    return pl.BlockSpec(shape, idx)


def _vmem_cap_bytes():
    """Per-core VMEM capacity with ~15% headroom for compiler scratch."""
    cap = None
    try:
        cap = getattr(pltpu.get_tpu_info(), "vmem_capacity_bytes", None)
    except Exception:
        cap = None
    if not cap:
        cap = 64 * 1024 * 1024  # conservative default (v7x per-core size)
    return int(cap * 0.85)


def _vmem_need_bytes(tm, Din_p, H_p, Dout_p, L, itemsize, weight_buffers):
    """Estimate of the kernel's VMEM footprint (all buffers accounted)."""
    weights = itemsize * (Din_p * H_p + H_p + L * (H_p * H_p + H_p)
                          + H_p * Dout_p + Dout_p) * weight_buffers
    x_tile = 2 * itemsize * tm * Din_p            # double-buffered input tile
    out_tile = 2 * 4 * tm * Dout_p                # double-buffered f32 output
    interm = (4 + itemsize) * tm * max(H_p, Dout_p)  # f32 h + in-flight bf16 copy
    return weights + x_tile + out_tile + interm


def _pick_tm(B, Din_p, H_p, Dout_p, L, itemsize, weight_buffers, budget):
    """Largest batch tile that fits VMEM, preferring >=2 grid steps (v7x)."""
    B_al = _round_up(max(B, 1), 16)  # bf16 sublane packing
    cands = [t for t in (1024, 512, 256, 128, 64, 32, 16) if t <= B_al] or [16]
    multi = [t for t in cands if _cdiv(B_al, t) >= 2]
    ordered = multi + [t for t in cands if t not in multi]
    for t in ordered:
        if _vmem_need_bytes(t, Din_p, H_p, Dout_p, L, itemsize,
                            weight_buffers) <= budget:
            return t
    return ordered[-1]


def _fused_mlp_kernel(x_ref, w_in_ref, b_in_ref, *rest, num_hidden_layers):
    """One batch tile of the full MLP; activations never leave VMEM/vregs."""
    if num_hidden_layers > 0:
        w_h_ref, b_h_ref, w_out_ref, b_out_ref, o_ref = rest
    else:
        w_out_ref, b_out_ref, o_ref = rest
        w_h_ref = b_h_ref = None

    cdt = w_in_ref.dtype  # bf16 compute dtype for MXU operands

    # Input layer: bf16 MXU matmul with f32 accumulation; bias + ReLU on VPU.
    h = jnp.dot(x_ref[...], w_in_ref[...], preferred_element_type=jnp.float32)
    h = jnp.maximum(h + b_in_ref[...].astype(jnp.float32), 0.0)
    # Dropout (eval mode) == identity.

    if num_hidden_layers > 0:
        def layer(hh, w, b):
            hh = jnp.dot(hh.astype(cdt), w, preferred_element_type=jnp.float32)
            return jnp.maximum(hh + b.astype(jnp.float32), 0.0)

        if num_hidden_layers <= 4:
            # Short stacks: static unroll gives the scheduler full visibility.
            for l in range(num_hidden_layers):
                h = layer(h, w_h_ref[l], b_h_ref[l])
        else:
            # Deep stacks: bounded code size / vreg pressure via fori_loop
            # with dynamic first-axis ref indexing.
            h = jax.lax.fori_loop(
                0, num_hidden_layers,
                lambda l, hh: layer(hh, w_h_ref[l], b_h_ref[l]), h)

    # Output layer: no activation.
    y = jnp.dot(h.astype(cdt), w_out_ref[...], preferred_element_type=jnp.float32)
    y = y + b_out_ref[...].astype(jnp.float32)
    o_ref[...] = y.astype(o_ref.dtype)


def prepare_params(params, *, compute_dtype=jnp.bfloat16):
    """One-time weight prep (call once, reuse every forward).

    Pads feature dims to lane-dense multiples of 128, casts to the MXU compute
    dtype (bf16) and stacks the hidden layers.  Weight layout is
    (in_features, out_features); bias is (1, out_features).
    """
    num_layers = len(params)
    assert num_layers >= 2, "need at least input and output layers"
    L = num_layers - 2
    Din = params[0][0].shape[0]
    H = params[0][0].shape[1]
    Dout = params[-1][0].shape[1]

    # NOTE: 128 keeps padding waste minimal for small dims; for large
    # MXU-bound shapes on v6e/v7x, padding K/N to 256 would match the
    # 2x256x256 MXU exactly.
    Din_p, H_p, Dout_p = (_round_up(d, 128) for d in (Din, H, Dout))

    def pad2(a, rows, cols):
        a = jnp.asarray(a, jnp.float32)
        return jnp.pad(a, ((0, rows - a.shape[0]),
                           (0, cols - a.shape[1]))).astype(compute_dtype)

    prepped = {
        "w_in": pad2(params[0][0], Din_p, H_p),
        "b_in": pad2(params[0][1], 1, H_p),
        "w_out": pad2(params[-1][0], H_p, Dout_p),
        "b_out": pad2(params[-1][1], 1, Dout_p),
        "w_h": None,
        "b_h": None,
        "dims": (Din, H, Dout, Din_p, H_p, Dout_p, L),
        "compute_dtype": compute_dtype,
    }
    if L > 0:
        prepped["w_h"] = jnp.stack([pad2(w, H_p, H_p) for (w, _) in params[1:-1]])
        prepped["b_h"] = jnp.stack([pad2(b, 1, H_p) for (_, b) in params[1:-1]])
    return prepped


def fused_mlp(x, prepped, *, tm=None):
    """Fused MLP forward.  x: (B, Din) float32; prepped: prepare_params(...)."""
    Din, H, Dout, Din_p, H_p, Dout_p, L = prepped["dims"]
    cdt = prepped["compute_dtype"]
    itemsize = jnp.dtype(cdt).itemsize
    B = x.shape[0]
    assert x.shape[1] == Din, (x.shape, Din)

    budget = _vmem_cap_bytes()
    weight_buffers = 1 if _SUPPORTS_BUFFERED else 2
    weight_bytes = itemsize * (Din_p * H_p + H_p + L * (H_p * H_p + H_p)
                               + H_p * Dout_p + Dout_p) * weight_buffers
    if weight_bytes > budget // 2:
        # TODO(synk): stream weight K/N tiles (reduction grid axis marked
        # "arbitrary" + f32 accumulator scratch) instead of keeping all
        # weights resident -- needed for very large H on v7x's 64 MiB VMEM.
        raise ValueError(
            f"resident weights ({weight_bytes / 2**20:.1f} MiB) exceed half "
            f"the VMEM budget ({budget / 2**20:.1f} MiB); weight-streaming "
            "fallback not implemented")

    if tm is None:
        tm = _pick_tm(B, Din_p, H_p, Dout_p, L, itemsize, weight_buffers, budget)
    tm = max(16, _round_up(tm, 16))  # bf16 sublane packing
    B_p = _round_up(B, tm)

    # Per-call work on x only (weights were prepped once): pad + cast.
    if (B_p, Din_p) == x.shape and x.dtype == cdt:
        x_p = x
    else:
        x_p = jnp.pad(x, ((0, B_p - B), (0, Din_p - Din))).astype(cdt)

    args = [x_p, prepped["w_in"], prepped["b_in"]]
    if L > 0:
        args += [prepped["w_h"], prepped["b_h"]]
    args += [prepped["w_out"], prepped["b_out"]]

    flops = 2 * B_p * (Din_p * H_p + L * H_p * H_p + H_p * Dout_p)
    bytes_accessed = (itemsize * (x_p.size + Din_p * H_p + L * H_p * H_p
                                  + H_p * Dout_p + (L + 2) * H_p)
                      + 4 * B_p * Dout_p)

    kernel = functools.partial(_fused_mlp_kernel, num_hidden_layers=L)

    def run(buffered):
        in_specs = [
            pl.BlockSpec((tm, Din_p), lambda i: (i, 0)),   # batch-tiled input
            _const_spec((Din_p, H_p), buffered),           # resident weights
            _const_spec((1, H_p), buffered),
        ]
        if L > 0:
            in_specs += [_const_spec((L, H_p, H_p), buffered),
                         _const_spec((L, 1, H_p), buffered)]
        in_specs += [_const_spec((H_p, Dout_p), buffered),
                     _const_spec((1, Dout_p), buffered)]

        wb = 1 if buffered else 2
        need = _vmem_need_bytes(tm, Din_p, H_p, Dout_p, L, itemsize, wb)
        vmem_limit = int(min(budget, max(int(need * 1.5), 32 * 1024 * 1024)))

        return pl.pallas_call(
            kernel,
            out_shape=jax.ShapeDtypeStruct((B_p, Dout_p), jnp.float32),
            grid=(B_p // tm,),
            in_specs=in_specs,
            out_specs=pl.BlockSpec((tm, Dout_p), lambda i: (i, 0)),
            compiler_params=pltpu.CompilerParams(
                dimension_semantics=("parallel",),
                vmem_limit_bytes=vmem_limit,
            ),
            cost_estimate=pl.CostEstimate(
                flops=flops, transcendentals=0, bytes_accessed=bytes_accessed),
        )(*args)

    try:
        out_p = run(_SUPPORTS_BUFFERED)
    except Exception:
        if not _SUPPORTS_BUFFERED:
            raise
        out_p = run(False)  # retry with default double-buffering

    # Strip batch / feature padding.
    return out_p[:B, :Dout]


def init_mlp_params(key, input_size, output_size, num_hidden_layers, hidden_size):
    """Deterministic parameter init mirroring the PyTorch module's shapes."""
    sizes = [(input_size, hidden_size)]
    sizes += [(hidden_size, hidden_size)] * num_hidden_layers
    sizes += [(hidden_size, output_size)]
    params = []
    for (din, dout) in sizes:
        key, wk, bk = jax.random.split(key, 3)
        bound = 1.0 / jnp.sqrt(din)
        w = jax.random.uniform(wk, (din, dout), jnp.float32, -bound, bound)
        b = jax.random.uniform(bk, (1, dout), jnp.float32, -bound, bound)
        params.append((w, b))
    return params


if __name__ == "__main__":
    # Small shapes consistent with the module's forward: x is (batch, input_size).
    # batch=256 with tm=128 (auto-picked) exercises a 2-step "parallel" grid.
    batch = 256
    input_size = 16
    hidden_size = 32
    output_size = 8
    num_hidden_layers = 2
    dropout = 0.1  # inference mode -> identity

    key = jax.random.PRNGKey(0)
    key, xk = jax.random.split(key)
    x = jax.random.normal(xk, (batch, input_size), jnp.float32)

    params = init_mlp_params(key, input_size, output_size,
                             num_hidden_layers, hidden_size)

    prepped = prepare_params(params)   # one-time weight pad/cast/stack
    out = fused_mlp(x, prepped)
    jax.block_until_ready(out)
    assert out.shape == (batch, output_size), out.shape

    # Sanity check against a pure-JAX f32 reference of the same forward pass.
    ref = x
    for idx, (w, b) in enumerate(params):
        ref = ref @ w + b
        if idx != len(params) - 1:
            ref = jnp.maximum(ref, 0.0)
    # bf16 MXU operands -> relaxed tolerance vs the f32 reference.
    assert jnp.allclose(out, ref, atol=5e-2, rtol=5e-2), \
        float(jnp.max(jnp.abs(out - ref)))

    print("KERNEL_OK")
</pallas_src>

<mosaic_0001>
module attributes {stable_mosaic.version = 11 : i64} {
  func.func @_fused_mlp_kernel(%arg0: i32, %arg1: memref<128x128xbf16, #tpu.memory_space<vmem>>, %arg2: memref<128x128xbf16, #tpu.memory_space<vmem>>, %arg3: memref<1x128xbf16, #tpu.memory_space<vmem>>, %arg4: memref<2x128x128xbf16, #tpu.memory_space<vmem>>, %arg5: memref<2x1x128xbf16, #tpu.memory_space<vmem>>, %arg6: memref<128x128xbf16, #tpu.memory_space<vmem>>, %arg7: memref<1x128xbf16, #tpu.memory_space<vmem>>, %arg8: memref<128x128xf32, #tpu.memory_space<vmem>>) attributes {dimension_semantics = [#tpu.dimension_semantics<parallel>], iteration_bounds = array<i64: 2>, scalar_prefetch = 0 : i64, scratch_operands = 0 : i64, tpu.core_type = #tpu.core_type<tc>, window_params = [{transform_indices = @transform_0, window_bounds = array<i64: 128, 128>}, {pipeline_mode = #tpu.pipeline_mode<synchronous>, transform_indices = @transform_1, window_bounds = array<i64: 128, 128>}, {pipeline_mode = #tpu.pipeline_mode<synchronous>, transform_indices = @transform_2, window_bounds = array<i64: 1, 128>}, {pipeline_mode = #tpu.pipeline_mode<synchronous>, transform_indices = @transform_3, window_bounds = array<i64: 2, 128, 128>}, {pipeline_mode = #tpu.pipeline_mode<synchronous>, transform_indices = @transform_4, window_bounds = array<i64: 2, 1, 128>}, {pipeline_mode = #tpu.pipeline_mode<synchronous>, transform_indices = @transform_5, window_bounds = array<i64: 128, 128>}, {pipeline_mode = #tpu.pipeline_mode<synchronous>, transform_indices = @transform_6, window_bounds = array<i64: 1, 128>}, {transform_indices = @transform_7, window_bounds = array<i64: 128, 128>}]} {
    %c0 = arith.constant 0 : index
    %c0_0 = arith.constant 0 : index
    %0 = vector.load %arg1[%c0, %c0_0] : memref<128x128xbf16, #tpu.memory_space<vmem>>, vector<128x128xbf16>
    %c0_1 = arith.constant 0 : index
    %c0_2 = arith.constant 0 : index
    %1 = vector.load %arg2[%c0_1, %c0_2] : memref<128x128xbf16, #tpu.memory_space<vmem>>, vector<128x128xbf16>
    %cst = arith.constant dense<0.000000e+00> : vector<128x128xf32>
    %2 = tpu.matmul %0, %1, %cst {dimension_numbers = #tpu.dot_dimension_numbers<[1], [0], [0], [1], [0, 0, 1, 1], [], []>} : vector<128x128xbf16>, vector<128x128xbf16>, vector<128x128xf32> -> vector<128x128xf32>
    %c0_3 = arith.constant 0 : index
    %c0_4 = arith.constant 0 : index
    %3 = vector.load %arg3[%c0_3, %c0_4] : memref<1x128xbf16, #tpu.memory_space<vmem>>, vector<1x128xbf16>
    %4 = arith.extf %3 : vector<1x128xbf16> to vector<1x128xf32>
    %5 = vector.broadcast %4 : vector<1x128xf32> to vector<128x128xf32>
    %6 = arith.addf %2, %5 : vector<128x128xf32>
    %cst_5 = arith.constant 0.000000e+00 : f32
    %7 = vector.broadcast %cst_5 : f32 to vector<128x128xf32>
    %8 = arith.maximumf %6, %7 : vector<128x128xf32>
    %c0_6 = arith.constant 0 : index
    %c0_7 = arith.constant 0 : index
    %c0_8 = arith.constant 0 : index
    %9 = vector.load %arg4[%c0_6, %c0_7, %c0_8] : memref<2x128x128xbf16, #tpu.memory_space<vmem>>, vector<1x128x128xbf16>
    %10 = vector.shape_cast %9 : vector<1x128x128xbf16> to vector<128x128xbf16>
    %c0_9 = arith.constant 0 : index
    %c0_10 = arith.constant 0 : index
    %c0_11 = arith.constant 0 : index
    %11 = vector.load %arg5[%c0_9, %c0_10, %c0_11] : memref<2x1x128xbf16, #tpu.memory_space<vmem>>, vector<1x1x128xbf16>
    %12 = vector.shape_cast %11 : vector<1x1x128xbf16> to vector<1x128xbf16>
    %13 = arith.truncf %8 : vector<128x128xf32> to vector<128x128xbf16>
    %cst_12 = arith.constant dense<0.000000e+00> : vector<128x128xf32>
    %14 = tpu.matmul %13, %10, %cst_12 {dimension_numbers = #tpu.dot_dimension_numbers<[1], [0], [0], [1], [0, 0, 1, 1], [], []>} : vector<128x128xbf16>, vector<128x128xbf16>, vector<128x128xf32> -> vector<128x128xf32>
    %15 = arith.extf %12 : vector<1x128xbf16> to vector<1x128xf32>
    %16 = vector.broadcast %15 : vector<1x128xf32> to vector<128x128xf32>
    %17 = arith.addf %14, %16 : vector<128x128xf32>
    %cst_13 = arith.constant 0.000000e+00 : f32
    %18 = vector.broadcast %cst_13 : f32 to vector<128x128xf32>
    %19 = arith.maximumf %17, %18 : vector<128x128xf32>
    %c1 = arith.constant 1 : index
    %c0_14 = arith.constant 0 : index
    %c0_15 = arith.constant 0 : index
    %20 = vector.load %arg4[%c1, %c0_14, %c0_15] : memref<2x128x128xbf16, #tpu.memory_space<vmem>>, vector<1x128x128xbf16>
    %21 = vector.shape_cast %20 : vector<1x128x128xbf16> to vector<128x128xbf16>
    %c1_16 = arith.constant 1 : index
    %c0_17 = arith.constant 0 : index
    %c0_18 = arith.constant 0 : index
    %22 = vector.load %arg5[%c1_16, %c0_17, %c0_18] : memref<2x1x128xbf16, #tpu.memory_space<vmem>>, vector<1x1x128xbf16>
    %23 = vector.shape_cast %22 : vector<1x1x128xbf16> to vector<1x128xbf16>
    %24 = arith.truncf %19 : vector<128x128xf32> to vector<128x128xbf16>
    %cst_19 = arith.constant dense<0.000000e+00> : vector<128x128xf32>
    %25 = tpu.matmul %24, %21, %cst_19 {dimension_numbers = #tpu.dot_dimension_numbers<[1], [0], [0], [1], [0, 0, 1, 1], [], []>} : vector<128x128xbf16>, vector<128x128xbf16>, vector<128x128xf32> -> vector<128x128xf32>
    %26 = arith.extf %23 : vector<1x128xbf16> to vector<1x128xf32>
    %27 = vector.broadcast %26 : vector<1x128xf32> to vector<128x128xf32>
    %28 = arith.addf %25, %27 : vector<128x128xf32>
    %cst_20 = arith.constant 0.000000e+00 : f32
    %29 = vector.broadcast %cst_20 : f32 to vector<128x128xf32>
    %30 = arith.maximumf %28, %29 : vector<128x128xf32>
    %31 = arith.truncf %30 : vector<128x128xf32> to vector<128x128xbf16>
    %c0_21 = arith.constant 0 : index
    %c0_22 = arith.constant 0 : index
    %32 = vector.load %arg6[%c0_21, %c0_22] : memref<128x128xbf16, #tpu.memory_space<vmem>>, vector<128x128xbf16>
    %cst_23 = arith.constant dense<0.000000e+00> : vector<128x128xf32>
    %33 = tpu.matmul %31, %32, %cst_23 {dimension_numbers = #tpu.dot_dimension_numbers<[1], [0], [0], [1], [0, 0, 1, 1], [], []>} : vector<128x128xbf16>, vector<128x128xbf16>, vector<128x128xf32> -> vector<128x128xf32>
    %c0_24 = arith.constant 0 : index
    %c0_25 = arith.constant 0 : index
    %34 = vector.load %arg7[%c0_24, %c0_25] : memref<1x128xbf16, #tpu.memory_space<vmem>>, vector<1x128xbf16>
    %35 = arith.extf %34 : vector<1x128xbf16> to vector<1x128xf32>
    %36 = vector.broadcast %35 : vector<1x128xf32> to vector<128x128xf32>
    %37 = arith.addf %33, %36 : vector<128x128xf32>
    %c0_26 = arith.constant 0 : index
    %c0_27 = arith.constant 0 : index
    %38 = vector.load %arg8[%c0_26, %c0_27] : memref<128x128xf32, #tpu.memory_space<vmem>>, vector<128x128xf32>
    tpu.vector_store %arg8[%c0_26, %c0_27], %37 {strides = array<i32>} : memref<128x128xf32, #tpu.memory_space<vmem>>, vector<128x128xf32>,
    return
  }
  func.func @transform_0(%arg0: i32) -> (i32, i32) {
    %c0_i32 = arith.constant 0 : i32
    %c0_i32_0 = arith.constant 0 : i32
    return %arg0, %c0_i32 : i32, i32
  }
  func.func @transform_1(%arg0: i32) -> (i32, i32) {
    %c0_i32 = arith.constant 0 : i32
    %c0_i32_0 = arith.constant 0 : i32
    %c0_i32_1 = arith.constant 0 : i32
    return %c0_i32, %c0_i32_0 : i32, i32
  }
  func.func @transform_2(%arg0: i32) -> (i32, i32) {
    %c0_i32 = arith.constant 0 : i32
    %c0_i32_0 = arith.constant 0 : i32
    %c0_i32_1 = arith.constant 0 : i32
    return %c0_i32, %c0_i32_0 : i32, i32
  }
  func.func @transform_3(%arg0: i32) -> (i32, i32, i32) {
    %c0_i32 = arith.constant 0 : i32
    %c0_i32_0 = arith.constant 0 : i32
    %c0_i32_1 = arith.constant 0 : i32
    %c0_i32_2 = arith.constant 0 : i32
    return %c0_i32, %c0_i32_0, %c0_i32_1 : i32, i32, i32
  }
  func.func @transform_4(%arg0: i32) -> (i32, i32, i32) {
    %c0_i32 = arith.constant 0 : i32
    %c0_i32_0 = arith.constant 0 : i32
    %c0_i32_1 = arith.constant 0 : i32
    %c0_i32_2 = arith.constant 0 : i32
    return %c0_i32, %c0_i32_0, %c0_i32_1 : i32, i32, i32
  }
  func.func @transform_5(%arg0: i32) -> (i32, i32) {
    %c0_i32 = arith.constant 0 : i32
    %c0_i32_0 = arith.constant 0 : i32
    %c0_i32_1 = arith.constant 0 : i32
    return %c0_i32, %c0_i32_0 : i32, i32
  }
  func.func @transform_6(%arg0: i32) -> (i32, i32) {
    %c0_i32 = arith.constant 0 : i32
    %c0_i32_0 = arith.constant 0 : i32
    %c0_i32_1 = arith.constant 0 : i32
    return %c0_i32, %c0_i32_0 : i32, i32
  }
  func.func @transform_7(%arg0: i32) -> (i32, i32) {
    %c0_i32 = arith.constant 0 : i32
    %c0_i32_0 = arith.constant 0 : i32
    return %arg0, %c0_i32 : i32, i32
  }
}

module attributes {stable_mosaic.version = 11 : i64} {
  func.func @_fused_mlp_kernel(%arg0: i32, %arg1: memref<128x128xbf16, #tpu.memory_space<vmem>>, %arg2: memref<128x128xbf16, #tpu.memory_space<vmem>>, %arg3: memref<1x128xbf16, #tpu.memory_space<vmem>>, %arg4: memref<2x128x128xbf16, #tpu.memory_space<vmem>>, %arg5: memref<2x1x128xbf16, #tpu.memory_space<vmem>>, %arg6: memref<128x128xbf16, #tpu.memory_space<vmem>>, %arg7: memref<1x128xbf16, #tpu.memory_space<vmem>>, %arg8: memref<128x128xf32, #tpu.memory_space<vmem>>) attributes {dimension_semantics = [#tpu.dimension_semantics<parallel>], iteration_bounds = array<i64: 2>, scalar_prefetch = 0 : i64, scratch_operands = 0 : i64, tpu.core_type = #tpu.core_type<tc>, window_params = [{transform_indices = @transform_0, window_bounds = array<i64: 128, 128>}, {pipeline_mode = #tpu.pipeline_mode<synchronous>, transform_indices = @transform_1, window_bounds = array<i64: 128, 128>}, {pipeline_mode = #tpu.pipeline_mode<synchronous>, transform_indices = @transform_2, window_bounds = array<i64: 1, 128>}, {pipeline_mode = #tpu.pipeline_mode<synchronous>, transform_indices = @transform_3, window_bounds = array<i64: 2, 128, 128>}, {pipeline_mode = #tpu.pipeline_mode<synchronous>, transform_indices = @transform_4, window_bounds = array<i64: 2, 1, 128>}, {pipeline_mode = #tpu.pipeline_mode<synchronous>, transform_indices = @transform_5, window_bounds = array<i64: 128, 128>}, {pipeline_mode = #tpu.pipeline_mode<synchronous>, transform_indices = @transform_6, window_bounds = array<i64: 1, 128>}, {transform_indices = @transform_7, window_bounds = array<i64: 128, 128>}]} {
    %c0 = arith.constant 0 : index
    %c0_0 = arith.constant 0 : index
    %0 = vector.load %arg1[%c0, %c0_0] : memref<128x128xbf16, #tpu.memory_space<vmem>>, vector<128x128xbf16>
    %c0_1 = arith.constant 0 : index
    %c0_2 = arith.constant 0 : index
    %1 = vector.load %arg2[%c0_1, %c0_2] : memref<128x128xbf16, #tpu.memory_space<vmem>>, vector<128x128xbf16>
    %cst = arith.constant dense<0.000000e+00> : vector<128x128xf32>
    %2 = tpu.matmul %0, %1, %cst {dimension_numbers = #tpu.dot_dimension_numbers<[1], [0], [0], [1], [0, 0, 1, 1], [], []>} : vector<128x128xbf16>, vector<128x128xbf16>, vector<128x128xf32> -> vector<128x128xf32>
    %c0_3 = arith.constant 0 : index
    %c0_4 = arith.constant 0 : index
    %3 = vector.load %arg3[%c0_3, %c0_4] : memref<1x128xbf16, #tpu.memory_space<vmem>>, vector<1x128xbf16>
    %4 = arith.extf %3 : vector<1x128xbf16> to vector<1x128xf32>
    %5 = vector.broadcast %4 : vector<1x128xf32> to vector<128x128xf32>
    %6 = arith.addf %2, %5 : vector<128x128xf32>
    %cst_5 = arith.constant 0.000000e+00 : f32
    %7 = vector.broadcast %cst_5 : f32 to vector<128x128xf32>
    %8 = arith.maximumf %6, %7 : vector<128x128xf32>
    %c0_6 = arith.constant 0 : index
    %c0_7 = arith.constant 0 : index
    %c0_8 = arith.constant 0 : index
    %9 = vector.load %arg4[%c0_6, %c0_7, %c0_8] : memref<2x128x128xbf16, #tpu.memory_space<vmem>>, vector<1x128x128xbf16>
    %10 = vector.shape_cast %9 : vector<1x128x128xbf16> to vector<128x128xbf16>
    %c0_9 = arith.constant 0 : index
    %c0_10 = arith.constant 0 : index
    %c0_11 = arith.constant 0 : index
    %11 = vector.load %arg5[%c0_9, %c0_10, %c0_11] : memref<2x1x128xbf16, #tpu.memory_space<vmem>>, vector<1x1x128xbf16>
    %12 = vector.shape_cast %11 : vector<1x1x128xbf16> to vector<1x128xbf16>
    %13 = arith.truncf %8 : vector<128x128xf32> to vector<128x128xbf16>
    %cst_12 = arith.constant dense<0.000000e+00> : vector<128x128xf32>
    %14 = tpu.matmul %13, %10, %cst_12 {dimension_numbers = #tpu.dot_dimension_numbers<[1], [0], [0], [1], [0, 0, 1, 1], [], []>} : vector<128x128xbf16>, vector<128x128xbf16>, vector<128x128xf32> -> vector<128x128xf32>
    %15 = arith.extf %12 : vector<1x128xbf16> to vector<1x128xf32>
    %16 = vector.broadcast %15 : vector<1x128xf32> to vector<128x128xf32>
    %17 = arith.addf %14, %16 : vector<128x128xf32>
    %cst_13 = arith.constant 0.000000e+00 : f32
    %18 = vector.broadcast %cst_13 : f32 to vector<128x128xf32>
    %19 = arith.maximumf %17, %18 : vector<128x128xf32>
    %c1 = arith.constant 1 : index
    %c0_14 = arith.constant 0 : index
    %c0_15 = arith.constant 0 : index
    %20 = vector.load %arg4[%c1, %c0_14, %c0_15] : memref<2x128x128xbf16, #tpu.memory_space<vmem>>, vector<1x128x128xbf16>
    %21 = vector.shape_cast %20 : vector<1x128x128xbf16> to vector<128x128xbf16>
    %c1_16 = arith.constant 1 : index
    %c0_17 = arith.constant 0 : index
    %c0_18 = arith.constant 0 : index
    %22 = vector.load %arg5[%c1_16, %c0_17, %c0_18] : memref<2x1x128xbf16, #tpu.memory_space<vmem>>, vector<1x1x128xbf16>
    %23 = vector.shape_cast %22 : vector<1x1x128xbf16> to vector<1x128xbf16>
    %24 = arith.truncf %19 : vector<128x128xf32> to vector<128x128xbf16>
    %cst_19 = arith.constant dense<0.000000e+00> : vector<128x128xf32>
    %25 = tpu.matmul %24, %21, %cst_19 {dimension_numbers = #tpu.dot_dimension_numbers<[1], [0], [0], [1], [0, 0, 1, 1], [], []>} : vector<128x128xbf16>, vector<128x128xbf16>, vector<128x128xf32> -> vector<128x128xf32>
    %26 = arith.extf %23 : vector<1x128xbf16> to vector<1x128xf32>
    %27 = vector.broadcast %26 : vector<1x128xf32> to vector<128x128xf32>
    %28 = arith.addf %25, %27 : vector<128x128xf32>
    %cst_20 = arith.constant 0.000000e+00 : f32
    %29 = vector.broadcast %cst_20 : f32 to vector<128x128xf32>
    %30 = arith.maximumf %28, %29 : vector<128x128xf32>
    %31 = arith.truncf %30 : vector<128x128xf32> to vector<128x128xbf16>
    %c0_21 = arith.constant 0 : index
    %c0_22 = arith.constant 0 : index
    %32 = vector.load %arg6[%c0_21, %c0_22] : memref<128x128xbf16, #tpu.memory_space<vmem>>, vector<128x128xbf16>
    %cst_23 = arith.constant dense<0.000000e+00> : vector<128x128xf32>
    %33 = tpu.matmul %31, %32, %cst_23 {dimension_numbers = #tpu.dot_dimension_numbers<[1], [0], [0], [1], [0, 0, 1, 1], [], []>} : vector<128x128xbf16>, vector<128x128xbf16>, vector<128x128xf32> -> vector<128x128xf32>
    %c0_24 = arith.constant 0 : index
    %c0_25 = arith.constant 0 : index
    %34 = vector.load %arg7[%c0_24, %c0_25] : memref<1x128xbf16, #tpu.memory_space<vmem>>, vector<1x128xbf16>
    %35 = arith.extf %34 : vector<1x128xbf16> to vector<1x128xf32>
    %36 = vector.broadcast %35 : vector<1x128xf32> to vector<128x128xf32>
    %37 = arith.addf %33, %36 : vector<128x128xf32>
    %c0_26 = arith.constant 0 : index
    %c0_27 = arith.constant 0 : index
    %38 = vector.load %arg8[%c0_26, %c0_27] : memref<128x128xf32, #tpu.memory_space<vmem>>, vector<128x128xf32>
    tpu.vector_store %arg8[%c0_26, %c0_27], %37 {strides = array<i32>} : memref<128x128xf32, #tpu.memory_space<vmem>>, vector<128x128xf32>,
    return
  }
  func.func @transform_0(%arg0: i32) -> (i32, i32) {
    %c0_i32 = arith.constant 0 : i32
    %c0_i32_0 = arith.constant 0 : i32
    return %arg0, %c0_i32 : i32, i32
  }
  func.func @transform_1(%arg0: i32) -> (i32, i32) {
    %c0_i32 = arith.constant 0 : i32
    %c0_i32_0 = arith.constant 0 : i32
    %c0_i32_1 = arith.constant 0 : i32
    return %c0_i32, %c0_i32_0 : i32, i32
  }
  func.func @transform_2(%arg0: i32) -> (i32, i32) {
    %c0_i32 = arith.constant 0 : i32
    %c0_i32_0 = arith.constant 0 : i32
    %c0_i32_1 = arith.constant 0 : i32
    return %c0_i32, %c0_i32_0 : i32, i32
  }
  func.func @transform_3(%arg0: i32) -> (i32, i32, i32) {
    %c0_i32 = arith.constant 0 : i32
    %c0_i32_0 = arith.constant 0 : i32
    %c0_i32_1 = arith.constant 0 : i32
    %c0_i32_2 = arith.constant 0 : i32
    return %c0_i32, %c0_i32_0, %c0_i32_1 : i32, i32, i32
  }
  func.func @transform_4(%arg0: i32) -> (i32, i32, i32) {
    %c0_i32 = arith.constant 0 : i32
    %c0_i32_0 = arith.constant 0 : i32
    %c0_i32_1 = arith.constant 0 : i32
    %c0_i32_2 = arith.constant 0 : i32
    return %c0_i32, %c0_i32_0, %c0_i32_1 : i32, i32, i32
  }
  func.func @transform_5(%arg0: i32) -> (i32, i32) {
    %c0_i32 = arith.constant 0 : i32
    %c0_i32_0 = arith.constant 0 : i32
    %c0_i32_1 = arith.constant 0 : i32
    return %c0_i32, %c0_i32_0 : i32, i32
  }
  func.func @transform_6(%arg0: i32) -> (i32, i32) {
    %c0_i32 = arith.constant 0 : i32
    %c0_i32_0 = arith.constant 0 : i32
    %c0_i32_1 = arith.constant 0 : i32
    return %c0_i32, %c0_i32_0 : i32, i32
  }
  func.func @transform_7(%arg0: i32) -> (i32, i32) {
    %c0_i32 = arith.constant 0 : i32
    %c0_i32_0 = arith.constant 0 : i32
    return %arg0, %c0_i32 : i32, i32
  }
}

</mosaic_0001>

<bundles_post_ra>
// kernel: tpu_custom_call.1
= control target key start
LH: loop header
LB: loop body
LE: loop exit
PB: predicated region body
PF: predicated region fallthrough
CT: control target
= control target key end

     0   :  { %s1882_s0 = inlined_call_operand.hbm [shape: bf16[256,128], index: 0, kind: input, shape index: {}]   ;;  %s1883_s1 = inlined_call_operand.hbm [shape: bf16[128,128], index: 1, kind: input, shape index: {}]   ;;  %s1884_s2 = inlined_call_operand.vmem [shape: bf16[1,128], index: 2, kind: input, shape index: {}]   ;;  %s1885_s3 = inlined_call_operand.hbm [shape: bf16[2,128,128], index: 3, kind: input, shape index: {}]   ;;  %s1886_s4 = inlined_call_operand.vmem [shape: bf16[2,1,128], index: 4, kind: input, shape index: {}]   ;;  %s1887_s5 = inlined_call_operand.hbm [shape: bf16[128,128], index: 5, kind: input, shape index: {}]   ;;  %s1888_s6 = inlined_call_operand.vmem [shape: bf16[1,128], index: 6, kind: input, shape index: {}]   ;;  %s1889_s7 = inlined_call_operand.hbm [shape: f32[256,128], index: 7, kind: output, shape index: {}]  }
   0x1   :  { %1892 = sst [smem:[#allocation15_spill]] %s1883_s1 }
   0x2   :  { %12 = vsyncpa [#allocation3], 0 }
   0x3   :  { %14 = vsyncpa [#allocation3 + $0x1], 0 }
   0x4   :  { %15 = vsyncpa [#allocation6], 0 }
   0x5   :  { %16 = vsyncpa [#allocation9], 0 }
   0x6   :  { %17 = vsyncpa [#allocation4], 0 }
   0x7   :  { %19 = vsyncpa [#allocation4 + $0x1], 0  ;;  %s1634_s24 = smov 0   ;;  %s1636_s25 = smov 0  }
   0x8   :  { %s1638_s26 = smov 0   ;;  %s1640_s27 = smov 0  }
   0x9 LB: > { %s1655_s28 = sadd.s32 4294967295, %s1585_s27   ;;  %s1087_s29 = sadd.s32 4294967294, %s1585_s27   ;;  %s1585_s27 = sphi %s1640_s27, %s1906_s27   ;;  %s1581_s26 = sphi %s1638_s26, %s1905_s26   ;;  %s1577_s25 = sphi %s1636_s25, %s1904_s25   ;;  %s1573_s24 = sphi %s1634_s24, %s1903_s24  }
   0xa   : > { %p45_p0 = scmp.ne.s32.totalorder %s1577_s25, %s1573_s24  ;;  %p46_p1 = scmp.eq.s32.totalorder %s1655_s28, 0 }
   0xb   : > { %p195_p2 = scmp.eq.s32.totalorder %s1655_s28, 1  ;;  %p201_p3 = scmp.eq.s32.totalorder %s1087_s29, 1 }
   0xc   : > { %p1664_p4 = por %p46_p1, %p45_p0  ;;  %p1088_p5 = scmp.ge.s32.totalorder %s1585_s27, 1 }
   0xd   : > { %p1669_p6 = por %p201_p3, %p45_p0  ;;  %p208_p7 = scmp.lt.s32.totalorder %s1585_s27, 3 }
   0xe   : > { %s1895_s1 = sld [smem:[#allocation15_spill]]  ;;  %s1587_s13 = smov [#allocation5]  }
   0xf   : > { %p1677_p8 = pnand %p1088_p5, %p208_p7  ;;  %s221_s14 = sshll.u32 %s1587_s13, 4  ;;  %s222_s14 = int_to_ptr.vmem [resolvable:$true] %s221_s14 }
  0x10   : > { %s236_s18 = sshll.u32 %s1885_s3, 4  ;;  %s1890_s19 = smov 64   ;;  %s237_s18 = int_to_ptr.hbm [resolvable:$true] %s236_s18 }
  0x11   : > { %p1326_p9 = pneg %p1677_p8  ;;  %s1891_s20 = smov 4  }
  0x12   : > { %s1590_s21 = smov [#allocation7]   ;;  %s253_s9 = sshll.u32 %s1887_s5, 4  ;;  %s254_s9 = int_to_ptr.hbm [resolvable:$true] %s253_s9 }
  0x13   : > { %p1685_p10 = pnand %p1326_p9, %p46_p1  ;;  %s238_s22 = sshll.u32 %s1590_s21, 4  ;;  %s239_s22 = int_to_ptr.vmem [resolvable:$true] %s238_s22 }
  0x14   : > { %s219_s11 = sshll.u32 %s1895_s1, 4  ;;  %s1591_s10 = smov [#allocation8]   ;;  %s220_s11 = int_to_ptr.hbm [resolvable:$true] %s219_s11 }
  0x15   : > { %1329 = dma.hbm_to_vmem [thread:$0]  (!%p1685_p10), %s220_s11, 1024, %s222_s14, [#allocation6], %s1890_s19, %s1890_s19, %s1891_s20  }
  0x16   : > { %1332 = dma.hbm_to_vmem [thread:$0]  (!%p1685_p10), %s237_s18, 2048, %s239_s22, [#allocation6], %s1890_s19, %s1890_s19, %s1891_s20  }
  0x17   : > { %s255_s11 = sshll.u32 %s1591_s10, 4  ;;  %s1707_s13 = sadd.s32 1, %s1585_s27   ;;  %s256_s11 = int_to_ptr.vmem [resolvable:$true] %s255_s11 }
  0x18   : > { %1335 = dma.hbm_to_vmem [thread:$0]  (!%p1685_p10), %s254_s9, 1024, %s256_s11, [#allocation9], %s1890_s19, %s1890_s19, %s1891_s20  }
  0x19   : > { %s29_s14 = ssub.s32 %s1585_s27, %s1707_s13  ;;  %s32_s16 = sadd.s32 1, %s1581_s26 }
  0x1a   : > { %p30_p12 = scmp.eq.s32.totalorder %s29_s14, 0  ;;  %p39_p13 = scmp.ne.s32.totalorder %s1581_s26, %s1577_s25 }
  0x1b   : > { %p40_p0 = scmp.eq.s32.totalorder %s1585_s27, 0  ;;  %p1347_p5 = scmp.lt.s32.totalorder %s1585_s27, 2 }
  0x1c   : > { %s1721_s17 = scalar_select %p30_p12, %s1581_s26, %s32_s16  }
  0x1d   : > { %p1725_p3 = por %p195_p2, %p39_p13  ;;  %s272_s21 = sand.u32 1, %s1581_s26  }
  0x1e   : > { %s1268_s15 = sshll.u32 %s1585_s27, 6  ;;  %p41_p7 = por %p40_p0, %p39_p13 }
  0x1f   : > { %s1093_s22 = sshll.u32 %s272_s21, 6  ;;  %s281_s9 = scalar_lea.hbm %s1882_s0, %s1268_s15 }
  0x20   : > { %s282_s10 = sshll.u32 %s281_s9, 4  ;;  %s276_s11 = scalar_lea.vmem [#allocation2], %s1093_s22  ;;  %s283_s10 = int_to_ptr.hbm [resolvable:$true] %s282_s10 }
  0x21   : > { %s284_s14 = sshll.u32 %s276_s11, 4  ;;  %p1735_p9 = pnand %p1347_p5, %p41_p7  ;;  %s285_s14 = int_to_ptr.vmem [resolvable:$true] %s284_s14 }
  0x22   : > { %s273_s19 = scalar_lea.sflag [#allocation3], %s272_s21  ;;  %s1481_s20 = sshra.s32 %s283_s10, 4  ;;  %s1482_s20 = int_to_ptr.hbm [resolvable:$true] %s1481_s20 }
  0x23   : > { %s1483_s1 = scalar_lea.hbm %s1482_s20, 64  ;;  %p1485_p10 = pneg %p1735_p9 }
  0x24   : > { %p1484_p2 = scmp.ne.s32.totalorder %s1482_s20, %s1483_s1  ;;  %s1488_s22 = scalar_lea.hbm %s1882_s0, 128 }
  0x25   : > { %p1489_p0 = scmp.lt.s32.totalorder %s1482_s20, %s1882_s0  ;;  %p1490_p5 = scmp.lt.s32.totalorder %s1488_s22, %s1483_s1 }
  0x26   : > { %p1486_p12 = pnand %p1485_p10, %p1484_p2 }
  0x27   : > { %p1491_p7 = por %p1490_p5, %p1489_p0 }
  0x28   : > { %p1487_p13 = pneg %p1486_p12 }
  0x2a   : > { %p1492_p11 = pnand %p1491_p7, %p1487_p13 }
  0x2c   : > { %1495 = shalt.err (!%p1492_p11)
}
  0x2d   : > { %s1900_s21 = smov 4   ;;  %s1901_s11 = smov 64  }
  0x2e   : > { %1339 = dma.hbm_to_vmem [thread:$0]  (!%p1735_p9), %s283_s10, 1024, %s285_s14, %s273_s19, %s1901_s11, %s1901_s11, %s1900_s21  }
  0x2f   : > { %296 = sbr.rel (%p1677_p8) target bundleno = 773 (0x305), region = 48  ;;  %s1755_s15 = sand.u32 (!%p1677_p8), 1, %s1577_s25  }
  0x30   : > { %s1097_s20 = sshll.u32 (!%p1677_p8), %s1755_s15, 6  ;;  %s299_s1 = scalar_lea.sflag (!%p1677_p8), [#allocation3], %s1755_s15 }
  0x31   : > { %s1759_s23 = scalar_lea.vmem (!%p1677_p8), [#allocation2], %s1097_s20 }
  0x34   : > { %1556 = dma.done.wait (%p1664_p4), %s299_s1, 1024  }
  0x35   : > { %1558 = vsyncadd (%p1664_p4), %s299_s1, 4294966272 }
  0x36   : > { %1560 = dma.done.wait (%p46_p1), [#allocation6], 3072  }
  0x37   : > { %1562 = vsyncadd (%p46_p1), [#allocation6], 4294964224 }
  0x38   : > { %1564 = dma.done.wait (%p46_p1), [#allocation9], 1024  }
  0x39   : > { %1566 = vsyncadd (%p46_p1), [#allocation9], 4294966272  ;;  %v1284_v0 = vld [vmem:[#allocation5 + $0x38] sm:$0xff]  ;;  %v1283_v1 = vld [vmem:[#allocation5 + $0x30] sm:$0xff]  ;;  %s1101_s9 = sshll.u32 %s1755_s15, 7  ;;  %s1309_s11 = sshll.u32 %s1655_s28, 7 }
  0x3a   : > { %482 = vmatpush.bf16.msra.mxu0 %v1284_v0  ;;  %v1282_v2 = vld [vmem:[#allocation5 + $0x28] sm:$0xff]  ;;  %v1281_v3 = vld [vmem:[#allocation5 + $0x20] sm:$0xff]  ;;  %v1280_v4 = vld [vmem:[#allocation5 + $0x18] sm:$0xff]  ;;  %s1830_s21 = scalar_lea.vmem [#allocation10], %s1101_s9  ;;  %s970_s19 = scalar_lea.sflag [#allocation4], %s1755_s15 }
  0x3b   : > { %v1279_v5 = vld [vmem:[#allocation5 + $0x10] sm:$0xff]  ;;  %v1278_v6 = vld [vmem:[#allocation5 + $0x8] sm:$0xff]  ;;  %v1277_v7 = vld [vmem:[#allocation5] sm:$0xff]  ;;  %s982_s30 = sshll.u32 %s1830_s21, 4  ;;  %s1531_s22 = scalar_lea.hbm %s1889_s7, 256  ;;  %s983_s30 = int_to_ptr.vmem [resolvable:$true] %s982_s30 }
  0x3c   : > { %v1269_v8 = vld [vmem:[%s1759_s23] sm:$0xff]  ;;  %v1270_v9 = vld [vmem:[%s1759_s23 + $0x8] sm:$0xff]  ;;  %v1271_v10 = vld [vmem:[%s1759_s23 + $0x10] sm:$0xff] }
  0x3d   : > { %v1272_v11 = vld [vmem:[%s1759_s23 + $0x18] sm:$0xff]  ;;  %v1273_v12 = vld [vmem:[%s1759_s23 + $0x20] sm:$0xff]  ;;  %v1274_v14 = vld [vmem:[%s1759_s23 + $0x28] sm:$0xff] }
  0x3e   : > { %483 = vmatpush.bf16.msra.mxu0 %v1283_v1  ;;  %v1292_v13 = vld [vmem:[#allocation7 + $0x38] sm:$0xff]  ;;  %v1291_v15 = vld [vmem:[#allocation7 + $0x30] sm:$0xff]  ;;  %v1290_v16 = vld [vmem:[#allocation7 + $0x28] sm:$0xff] }
  0x3f   : > { %622 = vmatpush.bf16.msra.mxu1 %v1292_v13  ;;  %v1289_v17 = vld [vmem:[#allocation7 + $0x20] sm:$0xff]  ;;  %v1288_v18 = vld [vmem:[#allocation7 + $0x18] sm:$0xff]  ;;  %v1275_v19 = vld [vmem:[%s1759_s23 + $0x30] sm:$0xff] }
  0x40   : > { %v1287_v20 = vld [vmem:[#allocation7 + $0x10] sm:$0xff]  ;;  %v1286_v21 = vld [vmem:[#allocation7 + $0x8] sm:$0xff]  ;;  %v1285_v22 = vld [vmem:[#allocation7] sm:$0xff] }
  0x41   : > { %v1276_v23 = vld [vmem:[%s1759_s23 + $0x38] sm:$0xff]  ;;  %v383_v24 = vld [vmem:[%s1884_s2] sm:$0x1]  ;;  %s981_s23 = scalar_lea.hbm %s1889_s7, %s1309_s11 }
  0x42   : > { %484 = vmatpush.bf16.msra.mxu0 %v1282_v2  ;;  %v384_v25 = vunpack.c.l.bf16 %v383_v24  ;;  %v1300_v2 = vld [vmem:[#allocation7 + $0x78] sm:$0xff]  ;;  %s984_s12 = sshll.u32 %s981_s23, 4  ;;  %s985_s12 = int_to_ptr.hbm [resolvable:$true] %s984_s12 }
  0x43   : > { %623 = vmatpush.bf16.msra.mxu1 %v1291_v15  ;;  %764 = vmatpush.bf16.msra.mxu2 %v1300_v2  ;;  %v1296_v13 = vld [vmem:[#allocation7 + $0x58] sm:$0xff]  ;;  %s1525_s10 = sshra.s32 %s985_s12, 4  ;;  %s1526_s10 = int_to_ptr.hbm [resolvable:$true] %s1525_s10 }
  0x44   : > { %v1784_v27 = vperm.slane %v384_v25, 0  ;;  %s1527_s14 = scalar_lea.hbm %s1526_s10, 128  ;;  %p1532_p11 = scmp.lt.s32.totalorder %s1526_s10, %s1889_s7 }
  0x45   : > { %p1528_p1 = scmp.ne.s32.totalorder %s1526_s10, %s1527_s14  ;;  %p1533_p9 = scmp.lt.s32.totalorder %s1531_s22, %s1527_s14 }
  0x46   : > { %485 = vmatpush.bf16.msra.mxu0 %v1281_v3 }
  0x47   : > { %624 = vmatpush.bf16.msra.mxu1 %v1290_v16  ;;  %p1529_p4 = pnand %p1528_p1, %p1725_p3  ;;  %p1534_p2 = por %p1533_p9, %p1532_p11 }
  0x49   : > { %p1530_p8 = pneg %p1529_p4 }
  0x4a   : > { %486 = vmatpush.bf16.msra.mxu0 %v1280_v4 }
  0x4b   : > { %625 = vmatpush.bf16.msra.mxu1 %v1289_v17  ;;  %v1295_v17 = vld [vmem:[#allocation7 + $0x50] sm:$0xff]  ;;  %p1535_p10 = pnand %p1534_p2, %p1530_p8 }
  0x4e   : > { %487 = vmatpush.bf16.msra.mxu0 %v1279_v5 }
  0x4f   : > { %626 = vmatpush.bf16.msra.mxu1 %v1288_v18 }
  0x52   : > { %488 = vmatpush.bf16.msra.mxu0 %v1278_v6  ;;  %v1299_v6 = vld [vmem:[#allocation7 + $0x70] sm:$0xff] }
  0x53   : > { %627 = vmatpush.bf16.msra.mxu1 %v1287_v20  ;;  %765 = vmatpush.bf16.msra.mxu2 %v1299_v6  ;;  %v1293_v20 = vld [vmem:[#allocation7 + $0x40] sm:$0xff] }
  0x56   : > { %489 = vmatpush.bf16.msra.mxu0 %v1277_v7 }
  0x57   : > { %628 = vmatpush.bf16.msra.mxu1 %v1286_v21 }
  0x59   : > { %490 = vmatmul.bf16.vlgmr.msra.gmra.mxu0 %v1269_v8  ;;  %v1298_v8 = vld [vmem:[#allocation7 + $0x68] sm:$0xff] }
  0x5a   : > { %766 = vmatpush.bf16.msra.mxu2 %v1298_v8  ;;  %v1308_v8 = vld [vmem:[#allocation8 + $0x38] sm:$0xff] }
  0x5b   : > { %629 = vmatpush.bf16.msra.mxu1 %v1285_v22  ;;  %904 = vmatpush.bf16.msra.mxu3 %v1308_v8 }
  0x69   : > { %495 = vmatmul.bf16.gmra.mxu0 %v1270_v9  ;;  %v1297_v9 = vld [vmem:[#allocation7 + $0x60] sm:$0xff] }
  0x6a   : > { %767 = vmatpush.bf16.msra.mxu2 %v1297_v9 }
  0x6e   : > { %768 = vmatpush.bf16.msra.mxu2 %v1296_v13 }
  0x72   : > { %769 = vmatpush.bf16.msra.mxu2 %v1295_v17 }
  0x79   : > { %500 = vmatmul.bf16.gmra.mxu0 %v1271_v10 }
  0x89   : > { %505 = vmatmul.bf16.gmra.mxu0 %v1272_v11 }
  0x99   : > { %510 = vmatmul.bf16.gmra.mxu0 %v1273_v12 }
  0xa9   : > { %515 = vmatmul.bf16.gmra.mxu0 %v1274_v14 }
  0xb9   : > { %520 = vmatmul.bf16.gmra.mxu0 %v1275_v19  ;;  %v1294_v19 = vld [vmem:[#allocation7 + $0x48] sm:$0xff] }
  0xba   : > { %770 = vmatpush.bf16.msra.mxu2 %v1294_v19 }
  0xbe   : > { %771 = vmatpush.bf16.msra.mxu2 %v1293_v20  ;;  %v1304_v20 = vld [vmem:[#allocation8 + $0x18] sm:$0xff] }
  0xc9   : > { %525 = vmatmul.bf16.gmra.mxu0 %v1276_v23 }
  0xd6   : > { %v491_v26 = vpop.f32.mrf.mxu0 }
  0xd7   : > { %v492_v28 = vadd.f32 %v491_v26, %v1784_v27 }
  0xd9   : > { %v531_v31 = vmax.f32 %v492_v28, 0.0  ;;  %v563_v28 = vld [vmem:[%s1886_s4] sm:$0x1] }
  0xde   : > { %v493_v29 = vpop.f32.mrf.mxu0 }
  0xdf   : > { %v494_v30 = vadd.f32 %v493_v29, %v1784_v27  ;;  %v572_v29 = vunpack.c.l.bf16 %v563_v28 }
  0xe1   : > { %v532_v32 = vmax.f32 %v494_v30, 0.0 }
  0xe3   : > { %v564_v33 = vpack.c.bf16 %v532_v32, %v531_v31  ;;  %v1805_v31 = vperm.slane %v572_v29, 0  ;;  %v1301_v29 = vld [vmem:[#allocation8] sm:$0xff] }
  0xe5   : > { %630 = vmatmul.bf16.vlgmr.msra.gmra.mxu1 %v564_v33 }
  0xe6   : > { %v496_v34 = vpop.f32.mrf.mxu0 }
  0xe7   : > { %v497_v35 = vadd.f32 %v496_v34, %v1784_v27 }
  0xe9   : > { %v533_v38 = vmax.f32 %v497_v35, 0.0 }
  0xee   : > { %v498_v36 = vpop.f32.mrf.mxu0 }
  0xef   : > { %v499_v37 = vadd.f32 %v498_v36, %v1784_v27 }
  0xf1   : > { %v534_v39 = vmax.f32 %v499_v37, 0.0 }
  0xf3   : > { %v565_v40 = vpack.c.bf16 %v534_v39, %v533_v38 }
  0xf5   : > { %635 = vmatmul.bf16.gmra.mxu1 %v565_v40 }
  0xf6   : > { %v501_v41 = vpop.f32.mrf.mxu0 }
  0xf7   : > { %v502_v42 = vadd.f32 %v501_v41, %v1784_v27 }
  0xf9   : > { %v535_v45 = vmax.f32 %v502_v42, 0.0 }
  0xfe   : > { %v503_v43 = vpop.f32.mrf.mxu0 }
  0xff   : > { %v504_v44 = vadd.f32 %v503_v43, %v1784_v27 }
 0x101   : > { %v536_v46 = vmax.f32 %v504_v44, 0.0 }
 0x103   : > { %v566_v47 = vpack.c.bf16 %v536_v46, %v535_v45 }
 0x105   : > { %640 = vmatmul.bf16.gmra.mxu1 %v566_v47 }
 0x106   : > { %v506_v48 = vpop.f32.mrf.mxu0 }
 0x107   : > { %v507_v49 = vadd.f32 %v506_v48, %v1784_v27 }
 0x109   : > { %v537_v52 = vmax.f32 %v507_v49, 0.0 }
 0x10e   : > { %v508_v50 = vpop.f32.mrf.mxu0 }
 0x10f   : > { %v509_v51 = vadd.f32 %v508_v50, %v1784_v27 }
 0x111   : > { %v538_v53 = vmax.f32 %v509_v51, 0.0 }
 0x113   : > { %v567_v54 = vpack.c.bf16 %v538_v53, %v537_v52 }
 0x115   : > { %645 = vmatmul.bf16.gmra.mxu1 %v567_v54 }
 0x116   : > { %v511_v55 = vpop.f32.mrf.mxu0 }
 0x117   : > { %v512_v56 = vadd.f32 %v511_v55, %v1784_v27 }
 0x119   : > { %v539_v59 = vmax.f32 %v512_v56, 0.0 }
 0x11e   : > { %v513_v57 = vpop.f32.mrf.mxu0 }
 0x11f   : > { %v514_v58 = vadd.f32 %v513_v57, %v1784_v27 }
 0x121   : > { %v540_v60 = vmax.f32 %v514_v58, 0.0 }
 0x123   : > { %v568_v61 = vpack.c.bf16 %v540_v60, %v539_v59 }
 0x125   : > { %650 = vmatmul.bf16.gmra.mxu1 %v568_v61 }
 0x126   : > { %v516_v62 = vpop.f32.mrf.mxu0 }
 0x127   : > { %v517_v63 = vadd.f32 %v516_v62, %v1784_v27 }
 0x129   : > { %v541_v3 = vmax.f32 %v517_v63, 0.0 }
 0x12e   : > { %v518_v0 = vpop.f32.mrf.mxu0 }
 0x12f   : > { %v519_v1 = vadd.f32 %v518_v0, %v1784_v27 }
 0x131   : > { %v542_v4 = vmax.f32 %v519_v1, 0.0 }
 0x133   : > { %v569_v5 = vpack.c.bf16 %v542_v4, %v541_v3 }
 0x135   : > { %655 = vmatmul.bf16.gmra.mxu1 %v569_v5 }
 0x136   : > { %v521_v7 = vpop.f32.mrf.mxu0 }
 0x137   : > { %v522_v10 = vadd.f32 %v521_v7, %v1784_v27 }
 0x139   : > { %v543_v14 = vmax.f32 %v522_v10, 0.0  ;;  %v1307_v10 = vld [vmem:[#allocation8 + $0x30] sm:$0xff] }
 0x13a   : > { %905 = vmatpush.bf16.msra.mxu3 %v1307_v10 }
 0x13e   : > { %v523_v11 = vpop.f32.mrf.mxu0 }
 0x13f   : > { %v524_v12 = vadd.f32 %v523_v11, %v1784_v27  ;;  %v1306_v11 = vld [vmem:[#allocation8 + $0x28] sm:$0xff] }
 0x140   : > { %906 = vmatpush.bf16.msra.mxu3 %v1306_v11 }
 0x141   : > { %v544_v15 = vmax.f32 %v524_v12, 0.0 }
 0x143   : > { %v570_v16 = vpack.c.bf16 %v544_v15, %v543_v14  ;;  %v1305_v15 = vld [vmem:[#allocation8 + $0x20] sm:$0xff] }
 0x144   : > { %907 = vmatpush.bf16.msra.mxu3 %v1305_v15 }
 0x145   : > { %660 = vmatmul.bf16.gmra.mxu1 %v570_v16 }
 0x146   : > { %v526_v18 = vpop.f32.mrf.mxu0 }
 0x147   : > { %v527_v21 = vadd.f32 %v526_v18, %v1784_v27 }
 0x148   : > { %908 = vmatpush.bf16.msra.mxu3 %v1304_v20 }
 0x149   : > { %v545_v24 = vmax.f32 %v527_v21, 0.0  ;;  %v1303_v21 = vld [vmem:[#allocation8 + $0x10] sm:$0xff] }
 0x14c   : > { %909 = vmatpush.bf16.msra.mxu3 %v1303_v21 }
 0x14e   : > { %v528_v22 = vpop.f32.mrf.mxu0 }
 0x14f   : > { %v529_v23 = vadd.f32 %v528_v22, %v1784_v27 }
 0x151   : > { %v546_v25 = vmax.f32 %v529_v23, 0.0 }
 0x153   : > { %v571_v26 = vpack.c.bf16 %v546_v25, %v545_v24  ;;  %v1302_v24 = vld [vmem:[#allocation8 + $0x8] sm:$0xff] }
 0x154   : > { %910 = vmatpush.bf16.msra.mxu3 %v1302_v24 }
 0x155   : > { %665 = vmatmul.bf16.gmra.mxu1 %v571_v26 }
 0x158   : > { %911 = vmatpush.bf16.msra.mxu3 %v1301_v29 }
 0x162   : > { %v631_v30 = vpop.f32.mrf.mxu1 }
 0x163   : > { %v632_v32 = vadd.f32 %v631_v30, %v1805_v31 }
 0x165   : > { %v671_v35 = vmax.f32 %v632_v32, 0.0  ;;  %v1198_v32 = vld [vmem:[%s1886_s4 + $0x1] sm:$0x1] }
 0x16a   : > { %v633_v33 = vpop.f32.mrf.mxu1 }
 0x16b   : > { %v634_v34 = vadd.f32 %v633_v33, %v1805_v31  ;;  %v714_v33 = vunpack.c.l.bf16 %v1198_v32 }
 0x16d   : > { %v672_v36 = vmax.f32 %v634_v34, 0.0 }
 0x16f   : > { %v706_v27 = vpack.c.bf16 %v672_v36, %v671_v35  ;;  %v715_v35 = vperm.slane %v714_v33, 0 }
 0x171   : > { %772 = vmatmul.bf16.vlgmr.msra.gmra.mxu2 %v706_v27 }
 0x172   : > { %v636_v37 = vpop.f32.mrf.mxu1 }
 0x173   : > { %v637_v38 = vadd.f32 %v636_v37, %v1805_v31 }
 0x175   : > { %v673_v41 = vmax.f32 %v637_v38, 0.0 }
 0x17a   : > { %v638_v39 = vpop.f32.mrf.mxu1 }
 0x17b   : > { %v639_v40 = vadd.f32 %v638_v39, %v1805_v31 }
 0x17d   : > { %v674_v42 = vmax.f32 %v639_v40, 0.0 }
 0x17f   : > { %v707_v43 = vpack.c.bf16 %v674_v42, %v673_v41 }
 0x181   : > { %777 = vmatmul.bf16.gmra.mxu2 %v707_v43 }
 0x182   : > { %v641_v44 = vpop.f32.mrf.mxu1 }
 0x183   : > { %v642_v45 = vadd.f32 %v641_v44, %v1805_v31 }
 0x185   : > { %v675_v48 = vmax.f32 %v642_v45, 0.0 }
 0x18a   : > { %v643_v46 = vpop.f32.mrf.mxu1 }
 0x18b   : > { %v644_v47 = vadd.f32 %v643_v46, %v1805_v31 }
 0x18d   : > { %v676_v49 = vmax.f32 %v644_v47, 0.0 }
 0x18f   : > { %v708_v50 = vpack.c.bf16 %v676_v49, %v675_v48 }
 0x191   : > { %782 = vmatmul.bf16.gmra.mxu2 %v708_v50 }
 0x192   : > { %v646_v51 = vpop.f32.mrf.mxu1 }
 0x193   : > { %v647_v52 = vadd.f32 %v646_v51, %v1805_v31 }
 0x195   : > { %v677_v55 = vmax.f32 %v647_v52, 0.0 }
 0x19a   : > { %v648_v53 = vpop.f32.mrf.mxu1 }
 0x19b   : > { %v649_v54 = vadd.f32 %v648_v53, %v1805_v31 }
 0x19d   : > { %v678_v56 = vmax.f32 %v649_v54, 0.0 }
 0x19f   : > { %v709_v57 = vpack.c.bf16 %v678_v56, %v677_v55 }
 0x1a1   : > { %787 = vmatmul.bf16.gmra.mxu2 %v709_v57 }
 0x1a2   : > { %v651_v58 = vpop.f32.mrf.mxu1 }
 0x1a3   : > { %v652_v59 = vadd.f32 %v651_v58, %v1805_v31 }
 0x1a5   : > { %v679_v62 = vmax.f32 %v652_v59, 0.0 }
 0x1aa   : > { %v653_v60 = vpop.f32.mrf.mxu1 }
 0x1ab   : > { %v654_v61 = vadd.f32 %v653_v60, %v1805_v31 }
 0x1ad   : > { %v680_v63 = vmax.f32 %v654_v61, 0.0 }
 0x1af   : > { %v710_v0 = vpack.c.bf16 %v680_v63, %v679_v62 }
 0x1b1   : > { %792 = vmatmul.bf16.gmra.mxu2 %v710_v0 }
 0x1b2   : > { %v656_v1 = vpop.f32.mrf.mxu1 }
 0x1b3   : > { %v657_v2 = vadd.f32 %v656_v1, %v1805_v31 }
 0x1b5   : > { %v681_v5 = vmax.f32 %v657_v2, 0.0 }
 0x1ba   : > { %v658_v3 = vpop.f32.mrf.mxu1 }
 0x1bb   : > { %v659_v4 = vadd.f32 %v658_v3, %v1805_v31 }
 0x1bd   : > { %v682_v6 = vmax.f32 %v659_v4, 0.0 }
 0x1bf   : > { %v711_v7 = vpack.c.bf16 %v682_v6, %v681_v5 }
 0x1c1   : > { %797 = vmatmul.bf16.gmra.mxu2 %v711_v7 }
 0x1c2   : > { %v661_v9 = vpop.f32.mrf.mxu1 }
 0x1c3   : > { %v662_v12 = vadd.f32 %v661_v9, %v1805_v31 }
 0x1c5   : > { %v683_v16 = vmax.f32 %v662_v12, 0.0 }
 0x1ca   : > { %v663_v13 = vpop.f32.mrf.mxu1 }
 0x1cb   : > { %v664_v14 = vadd.f32 %v663_v13, %v1805_v31 }
 0x1cd   : > { %v684_v17 = vmax.f32 %v664_v14, 0.0 }
 0x1cf   : > { %v712_v18 = vpack.c.bf16 %v684_v17, %v683_v16 }
 0x1d1   : > { %802 = vmatmul.bf16.gmra.mxu2 %v712_v18 }
 0x1d2   : > { %v666_v19 = vpop.f32.mrf.mxu1 }
 0x1d3   : > { %v667_v22 = vadd.f32 %v666_v19, %v1805_v31 }
 0x1d5   : > { %v685_v26 = vmax.f32 %v667_v22, 0.0 }
 0x1da   : > { %v668_v23 = vpop.f32.mrf.mxu1 }
 0x1db   : > { %v669_v25 = vadd.f32 %v668_v23, %v1805_v31 }
 0x1dd   : > { %v686_v28 = vmax.f32 %v669_v25, 0.0  ;;  %v853_v25 = vld [vmem:[%s1888_s6] sm:$0x1] }
 0x1df   : > { %v713_v30 = vpack.c.bf16 %v686_v28, %v685_v26  ;;  %v854_v26 = vunpack.c.l.bf16 %v853_v25 }
 0x1e1   : > { %807 = vmatmul.bf16.gmra.mxu2 %v713_v30  ;;  %v855_v28 = vperm.slane %v854_v26, 0 }
 0x1f4   : > { %v773_v34 = vpop.f32.mrf.mxu2 }
 0x1f5   : > { %v774_v36 = vadd.f32 %v773_v34, %v715_v35 }
 0x1f7   : > { %v813_v38 = vmax.f32 %v774_v36, 0.0 }
 0x1fc   : > { %v775_v27 = vpop.f32.mrf.mxu2 }
 0x1fd   : > { %v776_v37 = vadd.f32 %v775_v27, %v715_v35 }
 0x1ff   : > { %v814_v39 = vmax.f32 %v776_v37, 0.0 }
 0x201   : > { %v829_v31 = vpack.c.bf16 %v814_v39, %v813_v38 }
 0x203   : > { %912 = vmatmul.bf16.vlgmr.msra.gmra.mxu3 %v829_v31 }
 0x204   : > { %v778_v40 = vpop.f32.mrf.mxu2 }
 0x205   : > { %v779_v41 = vadd.f32 %v778_v40, %v715_v35 }
 0x207   : > { %v815_v44 = vmax.f32 %v779_v41, 0.0 }
 0x20c   : > { %v780_v42 = vpop.f32.mrf.mxu2 }
 0x20d   : > { %v781_v43 = vadd.f32 %v780_v42, %v715_v35 }
 0x20f   : > { %v816_v45 = vmax.f32 %v781_v43, 0.0 }
 0x211   : > { %v830_v46 = vpack.c.bf16 %v816_v45, %v815_v44 }
 0x213   : > { %917 = vmatmul.bf16.gmra.mxu3 %v830_v46 }
 0x214   : > { %v783_v47 = vpop.f32.mrf.mxu2 }
 0x215   : > { %v784_v48 = vadd.f32 %v783_v47, %v715_v35 }
 0x217   : > { %v817_v51 = vmax.f32 %v784_v48, 0.0 }
 0x21c   : > { %v785_v49 = vpop.f32.mrf.mxu2 }
 0x21d   : > { %v786_v50 = vadd.f32 %v785_v49, %v715_v35 }
 0x21f   : > { %v818_v52 = vmax.f32 %v786_v50, 0.0 }
 0x221   : > { %v831_v53 = vpack.c.bf16 %v818_v52, %v817_v51 }
 0x223   : > { %922 = vmatmul.bf16.gmra.mxu3 %v831_v53 }
 0x224   : > { %v788_v54 = vpop.f32.mrf.mxu2 }
 0x225   : > { %v789_v55 = vadd.f32 %v788_v54, %v715_v35 }
 0x227   : > { %v819_v58 = vmax.f32 %v789_v55, 0.0 }
 0x22c   : > { %v790_v56 = vpop.f32.mrf.mxu2 }
 0x22d   : > { %v791_v57 = vadd.f32 %v790_v56, %v715_v35 }
 0x22f   : > { %v820_v59 = vmax.f32 %v791_v57, 0.0 }
 0x231   : > { %v832_v60 = vpack.c.bf16 %v820_v59, %v819_v58 }
 0x233   : > { %927 = vmatmul.bf16.gmra.mxu3 %v832_v60 }
 0x234   : > { %v793_v61 = vpop.f32.mrf.mxu2 }
 0x235   : > { %v794_v62 = vadd.f32 %v793_v61, %v715_v35 }
 0x237   : > { %v821_v1 = vmax.f32 %v794_v62, 0.0 }
 0x23c   : > { %v795_v63 = vpop.f32.mrf.mxu2 }
 0x23d   : > { %v796_v0 = vadd.f32 %v795_v63, %v715_v35 }
 0x23f   : > { %v822_v2 = vmax.f32 %v796_v0, 0.0 }
 0x241   : > { %v833_v3 = vpack.c.bf16 %v822_v2, %v821_v1 }
 0x243   : > { %932 = vmatmul.bf16.gmra.mxu3 %v833_v3 }
 0x244   : > { %v798_v4 = vpop.f32.mrf.mxu2 }
 0x245   : > { %v799_v5 = vadd.f32 %v798_v4, %v715_v35 }
 0x247   : > { %v823_v8 = vmax.f32 %v799_v5, 0.0 }
 0x24c   : > { %v800_v6 = vpop.f32.mrf.mxu2 }
 0x24d   : > { %v801_v7 = vadd.f32 %v800_v6, %v715_v35 }
 0x24f   : > { %v824_v9 = vmax.f32 %v801_v7, 0.0 }
 0x251   : > { %v834_v10 = vpack.c.bf16 %v824_v9, %v823_v8 }
 0x253   : > { %937 = vmatmul.bf16.gmra.mxu3 %v834_v10 }
 0x254   : > { %v803_v11 = vpop.f32.mrf.mxu2 }
 0x255   : > { %v804_v12 = vadd.f32 %v803_v11, %v715_v35 }
 0x257   : > { %v825_v15 = vmax.f32 %v804_v12, 0.0 }
 0x25c   : > { %v805_v13 = vpop.f32.mrf.mxu2 }
 0x25d   : > { %v806_v14 = vadd.f32 %v805_v13, %v715_v35 }
 0x25f   : > { %v826_v16 = vmax.f32 %v806_v14, 0.0 }
 0x261   : > { %v835_v17 = vpack.c.bf16 %v826_v16, %v825_v15 }
 0x263   : > { %942 = vmatmul.bf16.gmra.mxu3 %v835_v17 }
 0x264   : > { %v808_v18 = vpop.f32.mrf.mxu2 }
 0x265   : > { %v809_v19 = vadd.f32 %v808_v18, %v715_v35 }
 0x267   : > { %v827_v22 = vmax.f32 %v809_v19, 0.0 }
 0x26c   : > { %v810_v20 = vpop.f32.mrf.mxu2 }
 0x26d   : > { %v811_v21 = vadd.f32 %v810_v20, %v715_v35 }
 0x26f   : > { %v828_v23 = vmax.f32 %v811_v21, 0.0 }
 0x271   : > { %v836_v24 = vpack.c.bf16 %v828_v23, %v827_v22 }
 0x273   : > { %947 = vmatmul.bf16.gmra.mxu3 %v836_v24 }
 0x286   : > { %v913_v29 = vpop.f32.mrf.mxu3 }
 0x287   : > { %v914_v30 = vadd.f32 %v913_v29, %v855_v28 }
 0x289   : > { %953 = vst [vmem:[%s1830_s21] sm:$0xff] %v914_v30 }
 0x28e   : > { %v915_v32 = vpop.f32.mrf.mxu3 }
 0x28f   : > { %v916_v33 = vadd.f32 %v915_v32, %v855_v28 }
 0x291   : > { %954 = vst [vmem:[%s1830_s21 + $0x8] sm:$0xff] %v916_v33 }
 0x296   : > { %v918_v34 = vpop.f32.mrf.mxu3 }
 0x297   : > { %v919_v35 = vadd.f32 %v918_v34, %v855_v28 }
 0x299   : > { %955 = vst [vmem:[%s1830_s21 + $0x10] sm:$0xff] %v919_v35 }
 0x29e   : > { %v920_v36 = vpop.f32.mrf.mxu3 }
 0x29f   : > { %v921_v27 = vadd.f32 %v920_v36, %v855_v28 }
 0x2a1   : > { %956 = vst [vmem:[%s1830_s21 + $0x18] sm:$0xff] %v921_v27 }
 0x2a6   : > { %v923_v37 = vpop.f32.mrf.mxu3 }
 0x2a7   : > { %v924_v38 = vadd.f32 %v923_v37, %v855_v28 }
 0x2a9   : > { %957 = vst [vmem:[%s1830_s21 + $0x20] sm:$0xff] %v924_v38 }
 0x2ae   : > { %v925_v39 = vpop.f32.mrf.mxu3 }
 0x2af   : > { %v926_v31 = vadd.f32 %v925_v39, %v855_v28 }
 0x2b1   : > { %958 = vst [vmem:[%s1830_s21 + $0x28] sm:$0xff] %v926_v31 }
 0x2b6   : > { %v928_v40 = vpop.f32.mrf.mxu3 }
 0x2b7   : > { %v929_v41 = vadd.f32 %v928_v40, %v855_v28 }
 0x2b9   : > { %959 = vst [vmem:[%s1830_s21 + $0x30] sm:$0xff] %v929_v41 }
 0x2be   : > { %v930_v42 = vpop.f32.mrf.mxu3 }
 0x2bf   : > { %v931_v43 = vadd.f32 %v930_v42, %v855_v28 }
 0x2c1   : > { %960 = vst [vmem:[%s1830_s21 + $0x38] sm:$0xff] %v931_v43 }
 0x2c6   : > { %v933_v44 = vpop.f32.mrf.mxu3 }
 0x2c7   : > { %v934_v45 = vadd.f32 %v933_v44, %v855_v28 }
 0x2c9   : > { %961 = vst [vmem:[%s1830_s21 + $0x40] sm:$0xff] %v934_v45 }
 0x2ce   : > { %v935_v46 = vpop.f32.mrf.mxu3 }
 0x2cf   : > { %v936_v47 = vadd.f32 %v935_v46, %v855_v28 }
 0x2d1   : > { %962 = vst [vmem:[%s1830_s21 + $0x48] sm:$0xff] %v936_v47 }
 0x2d6   : > { %v938_v48 = vpop.f32.mrf.mxu3 }
 0x2d7   : > { %v939_v49 = vadd.f32 %v938_v48, %v855_v28 }
 0x2d9   : > { %963 = vst [vmem:[%s1830_s21 + $0x50] sm:$0xff] %v939_v49 }
 0x2de   : > { %v940_v50 = vpop.f32.mrf.mxu3 }
 0x2df   : > { %v941_v51 = vadd.f32 %v940_v50, %v855_v28 }
 0x2e1   : > { %964 = vst [vmem:[%s1830_s21 + $0x58] sm:$0xff] %v941_v51 }
 0x2e6   : > { %v943_v52 = vpop.f32.mrf.mxu3 }
 0x2e7   : > { %v944_v53 = vadd.f32 %v943_v52, %v855_v28 }
 0x2e9   : > { %965 = vst [vmem:[%s1830_s21 + $0x60] sm:$0xff] %v944_v53 }
 0x2ee   : > { %v945_v54 = vpop.f32.mrf.mxu3 }
 0x2ef   : > { %v946_v55 = vadd.f32 %v945_v54, %v855_v28 }
 0x2f1   : > { %966 = vst [vmem:[%s1830_s21 + $0x68] sm:$0xff] %v946_v55 }
 0x2f6   : > { %v948_v56 = vpop.f32.mrf.mxu3 }
 0x2f7   : > { %v949_v57 = vadd.f32 %v948_v56, %v855_v28 }
 0x2f9   : > { %967 = vst [vmem:[%s1830_s21 + $0x70] sm:$0xff] %v949_v57 }
 0x2fe   : > { %v950_v58 = vpop.f32.mrf.mxu3 }
 0x2ff   : > { %v951_v59 = vadd.f32 %v950_v58, %v855_v28 }
 0x301   : > { %968 = vst [vmem:[%s1830_s21 + $0x78] sm:$0xff] %v951_v59 }
 0x302   : > { %1538 = shalt.err (!%p1535_p10)
}
 0x303   : > { %s1592_s15 = smov 128   ;;  %s1593_s21 = smov 8  }
 0x304   : > { %1324 = dma.vmem_to_hbm [thread:$0]  (%p1725_p3), %s983_s30, 2048, %s985_s12, %s970_s19, %s1592_s15, %s1592_s15, %s1593_s21  }
 0x305 PF: > { %s999_s11 = sand.u32 1, %s1573_s24   ;;  %p1902_p12 = scmp.ge.s32.totalorder %s1585_s27, 2 }
 0x306   : > { %s1000_s20 = scalar_lea.sflag [#allocation4], %s999_s11 }
 0x307   : > { %p1341_p13 = pnand %p1902_p12, %p1669_p6 }
 0x309   : > { %p1342_p0 = pneg %p1341_p13 }
 0x30b   : > { %1568 = dma.done.wait (%p1342_p0), %s1000_s20, 2048  }
 0x30c   : > { %1570 = vsyncadd (%p1342_p0), %s1000_s20, 4294965248  ;;  %p22_p5 = scmp.ge.s32.totalorder %s1707_s13, 4   ;;  %s1903_s24 = smov %s1577_s25 }
 0x30d   : > { %s1904_s25 = smov %s1581_s26  ;;  %s1905_s26 = smov %s1721_s17 }
 0x30e   : > { %s1906_s27 = smov %s1707_s13  ;;  %24 = sbr.rel (!%p22_p5) target bundleno = 9 (0x9), region = 107 }
 0x313   :  { %1006 = vsyncpa [#allocation3], 1 }
 0x314   :  { %1008 = vsyncpa [#allocation3 + $0x1], 1 }
 0x315   :  { %1009 = vsyncpa [#allocation6], 1 }
 0x316   :  { %1010 = vsyncpa [#allocation9], 1 }
 0x317   :  { %1011 = vsyncpa [#allocation4], 1 }
 0x318   :  { %1013 = vsyncpa [#allocation4 + $0x1], 1 }

// kernel: tpu_custom_call.1
= control target key start
LH: loop header
LB: loop body
LE: loop exit
PB: predicated region body
PF: predicated region fallthrough
CT: control target
= control target key end

     0   :  { %s1882_s0 = inlined_call_operand.hbm [shape: bf16[256,128], index: 0, kind: input, shape index: {}]   ;;  %s1883_s1 = inlined_call_operand.hbm [shape: bf16[128,128], index: 1, kind: input, shape index: {}]   ;;  %s1884_s2 = inlined_call_operand.vmem [shape: bf16[1,128], index: 2, kind: input, shape index: {}]   ;;  %s1885_s3 = inlined_call_operand.hbm [shape: bf16[2,128,128], index: 3, kind: input, shape index: {}]   ;;  %s1886_s4 = inlined_call_operand.vmem [shape: bf16[2,1,128], index: 4, kind: input, shape index: {}]   ;;  %s1887_s5 = inlined_call_operand.hbm [shape: bf16[128,128], index: 5, kind: input, shape index: {}]   ;;  %s1888_s6 = inlined_call_operand.vmem [shape: bf16[1,128], index: 6, kind: input, shape index: {}]   ;;  %s1889_s7 = inlined_call_operand.hbm [shape: f32[256,128], index: 7, kind: output, shape index: {}]  }
   0x1   :  { %1892 = sst [smem:[#allocation15_spill]] %s1883_s1 }
   0x2   :  { %12 = vsyncpa [#allocation3], 0 }
   0x3   :  { %14 = vsyncpa [#allocation3 + $0x1], 0 }
   0x4   :  { %15 = vsyncpa [#allocation6], 0 }
   0x5   :  { %16 = vsyncpa [#allocation9], 0 }
   0x6   :  { %17 = vsyncpa [#allocation4], 0 }
   0x7   :  { %19 = vsyncpa [#allocation4 + $0x1], 0  ;;  %s1634_s24 = smov 0   ;;  %s1636_s25 = smov 0  }
   0x8   :  { %s1638_s26 = smov 0   ;;  %s1640_s27 = smov 0  }
   0x9 LB: > { %s1655_s28 = sadd.s32 4294967295, %s1585_s27   ;;  %s1087_s29 = sadd.s32 4294967294, %s1585_s27   ;;  %s1585_s27 = sphi %s1640_s27, %s1906_s27   ;;  %s1581_s26 = sphi %s1638_s26, %s1905_s26   ;;  %s1577_s25 = sphi %s1636_s25, %s1904_s25   ;;  %s1573_s24 = sphi %s1634_s24, %s1903_s24  }
   0xa   : > { %p45_p0 = scmp.ne.s32.totalorder %s1577_s25, %s1573_s24  ;;  %p46_p1 = scmp.eq.s32.totalorder %s1655_s28, 0 }
   0xb   : > { %p195_p2 = scmp.eq.s32.totalorder %s1655_s28, 1  ;;  %p201_p3 = scmp.eq.s32.totalorder %s1087_s29, 1 }
   0xc   : > { %p1664_p4 = por %p46_p1, %p45_p0  ;;  %p1088_p5 = scmp.ge.s32.totalorder %s1585_s27, 1 }
   0xd   : > { %p1669_p6 = por %p201_p3, %p45_p0  ;;  %p208_p7 = scmp.lt.s32.totalorder %s1585_s27, 3 }
   0xe   : > { %s1895_s1 = sld [smem:[#allocation15_spill]]  ;;  %s1587_s13 = smov [#allocation5]  }
   0xf   : > { %p1677_p8 = pnand %p1088_p5, %p208_p7  ;;  %s221_s14 = sshll.u32 %s1587_s13, 4  ;;  %s222_s14 = int_to_ptr.vmem [resolvable:$true] %s221_s14 }
  0x10   : > { %s236_s18 = sshll.u32 %s1885_s3, 4  ;;  %s1890_s19 = smov 64   ;;  %s237_s18 = int_to_ptr.hbm [resolvable:$true] %s236_s18 }
  0x11   : > { %p1326_p9 = pneg %p1677_p8  ;;  %s1891_s20 = smov 4  }
  0x12   : > { %s1590_s21 = smov [#allocation7]   ;;  %s253_s9 = sshll.u32 %s1887_s5, 4  ;;  %s254_s9 = int_to_ptr.hbm [resolvable:$true] %s253_s9 }
  0x13   : > { %p1685_p10 = pnand %p1326_p9, %p46_p1  ;;  %s238_s22 = sshll.u32 %s1590_s21, 4  ;;  %s239_s22 = int_to_ptr.vmem [resolvable:$true] %s238_s22 }
  0x14   : > { %s219_s11 = sshll.u32 %s1895_s1, 4  ;;  %s1591_s10 = smov [#allocation8]   ;;  %s220_s11 = int_to_ptr.hbm [resolvable:$true] %s219_s11 }
  0x15   : > { %1329 = dma.hbm_to_vmem [thread:$0]  (!%p1685_p10), %s220_s11, 1024, %s222_s14, [#allocation6], %s1890_s19, %s1890_s19, %s1891_s20  }
  0x16   : > { %1332 = dma.hbm_to_vmem [thread:$0]  (!%p1685_p10), %s237_s18, 2048, %s239_s22, [#allocation6], %s1890_s19, %s1890_s19, %s1891_s20  }
  0x17   : > { %s255_s11 = sshll.u32 %s1591_s10, 4  ;;  %s1707_s13 = sadd.s32 1, %s1585_s27   ;;  %s256_s11 = int_to_ptr.vmem [resolvable:$true] %s255_s11 }
  0x18   : > { %1335 = dma.hbm_to_vmem [thread:$0]  (!%p1685_p10), %s254_s9, 1024, %s256_s11, [#allocation9], %s1890_s19, %s1890_s19, %s1891_s20  }
  0x19   : > { %s29_s14 = ssub.s32 %s1585_s27, %s1707_s13  ;;  %s32_s16 = sadd.s32 1, %s1581_s26 }
  0x1a   : > { %p30_p12 = scmp.eq.s32.totalorder %s29_s14, 0  ;;  %p39_p13 = scmp.ne.s32.totalorder %s1581_s26, %s1577_s25 }
  0x1b   : > { %p40_p0 = scmp.eq.s32.totalorder %s1585_s27, 0  ;;  %p1347_p5 = scmp.lt.s32.totalorder %s1585_s27, 2 }
  0x1c   : > { %s1721_s17 = scalar_select %p30_p12, %s1581_s26, %s32_s16  }
  0x1d   : > { %p1725_p3 = por %p195_p2, %p39_p13  ;;  %s272_s21 = sand.u32 1, %s1581_s26  }
  0x1e   : > { %s1268_s15 = sshll.u32 %s1585_s27, 6  ;;  %p41_p7 = por %p40_p0, %p39_p13 }
  0x1f   : > { %s1093_s22 = sshll.u32 %s272_s21, 6  ;;  %s281_s9 = scalar_lea.hbm %s1882_s0, %s1268_s15 }
  0x20   : > { %s282_s10 = sshll.u32 %s281_s9, 4  ;;  %s276_s11 = scalar_lea.vmem [#allocation2], %s1093_s22  ;;  %s283_s10 = int_to_ptr.hbm [resolvable:$true] %s282_s10 }
  0x21   : > { %s284_s14 = sshll.u32 %s276_s11, 4  ;;  %p1735_p9 = pnand %p1347_p5, %p41_p7  ;;  %s285_s14 = int_to_ptr.vmem [resolvable:$true] %s284_s14 }
  0x22   : > { %s273_s19 = scalar_lea.sflag [#allocation3], %s272_s21  ;;  %s1481_s20 = sshra.s32 %s283_s10, 4  ;;  %s1482_s20 = int_to_ptr.hbm [resolvable:$true] %s1481_s20 }
  0x23   : > { %s1483_s1 = scalar_lea.hbm %s1482_s20, 64  ;;  %p1485_p10 = pneg %p1735_p9 }
  0x24   : > { %p1484_p2 = scmp.ne.s32.totalorder %s1482_s20, %s1483_s1  ;;  %s1488_s22 = scalar_lea.hbm %s1882_s0, 128 }
  0x25   : > { %p1489_p0 = scmp.lt.s32.totalorder %s1482_s20, %s1882_s0  ;;  %p1490_p5 = scmp.lt.s32.totalorder %s1488_s22, %s1483_s1 }
  0x26   : > { %p1486_p12 = pnand %p1485_p10, %p1484_p2 }
  0x27   : > { %p1491_p7 = por %p1490_p5, %p1489_p0 }
  0x28   : > { %p1487_p13 = pneg %p1486_p12 }
  0x2a   : > { %p1492_p11 = pnand %p1491_p7, %p1487_p13 }
  0x2c   : > { %1495 = shalt.err (!%p1492_p11)
}
  0x2d   : > { %s1900_s21 = smov 4   ;;  %s1901_s11 = smov 64  }
  0x2e   : > { %1339 = dma.hbm_to_vmem [thread:$0]  (!%p1735_p9), %s283_s10, 1024, %s285_s14, %s273_s19, %s1901_s11, %s1901_s11, %s1900_s21  }
  0x2f   : > { %296 = sbr.rel (%p1677_p8) target bundleno = 773 (0x305), region = 48  ;;  %s1755_s15 = sand.u32 (!%p1677_p8), 1, %s1577_s25  }
  0x30   : > { %s1097_s20 = sshll.u32 (!%p1677_p8), %s1755_s15, 6  ;;  %s299_s1 = scalar_lea.sflag (!%p1677_p8), [#allocation3], %s1755_s15 }
  0x31   : > { %s1759_s23 = scalar_lea.vmem (!%p1677_p8), [#allocation2], %s1097_s20 }
  0x34   : > { %1556 = dma.done.wait (%p1664_p4), %s299_s1, 1024  }
  0x35   : > { %1558 = vsyncadd (%p1664_p4), %s299_s1, 4294966272 }
  0x36   : > { %1560 = dma.done.wait (%p46_p1), [#allocation6], 3072  }
  0x37   : > { %1562 = vsyncadd (%p46_p1), [#allocation6], 4294964224 }
  0x38   : > { %1564 = dma.done.wait (%p46_p1), [#allocation9], 1024  }
  0x39   : > { %1566 = vsyncadd (%p46_p1), [#allocation9], 4294966272  ;;  %v1284_v0 = vld [vmem:[#allocation5 + $0x38] sm:$0xff]  ;;  %v1283_v1 = vld [vmem:[#allocation5 + $0x30] sm:$0xff]  ;;  %s1101_s9 = sshll.u32 %s1755_s15, 7  ;;  %s1309_s11 = sshll.u32 %s1655_s28, 7 }
  0x3a   : > { %482 = vmatpush.bf16.msra.mxu0 %v1284_v0  ;;  %v1282_v2 = vld [vmem:[#allocation5 + $0x28] sm:$0xff]  ;;  %v1281_v3 = vld [vmem:[#allocation5 + $0x20] sm:$0xff]  ;;  %v1280_v4 = vld [vmem:[#allocation5 + $0x18] sm:$0xff]  ;;  %s1830_s21 = scalar_lea.vmem [#allocation10], %s1101_s9  ;;  %s970_s19 = scalar_lea.sflag [#allocation4], %s1755_s15 }
  0x3b   : > { %v1279_v5 = vld [vmem:[#allocation5 + $0x10] sm:$0xff]  ;;  %v1278_v6 = vld [vmem:[#allocation5 + $0x8] sm:$0xff]  ;;  %v1277_v7 = vld [vmem:[#allocation5] sm:$0xff]  ;;  %s982_s30 = sshll.u32 %s1830_s21, 4  ;;  %s1531_s22 = scalar_lea.hbm %s1889_s7, 256  ;;  %s983_s30 = int_to_ptr.vmem [resolvable:$true] %s982_s30 }
  0x3c   : > { %v1269_v8 = vld [vmem:[%s1759_s23] sm:$0xff]  ;;  %v1270_v9 = vld [vmem:[%s1759_s23 + $0x8] sm:$0xff]  ;;  %v1271_v10 = vld [vmem:[%s1759_s23 + $0x10] sm:$0xff] }
  0x3d   : > { %v1272_v11 = vld [vmem:[%s1759_s23 + $0x18] sm:$0xff]  ;;  %v1273_v12 = vld [vmem:[%s1759_s23 + $0x20] sm:$0xff]  ;;  %v1274_v14 = vld [vmem:[%s1759_s23 + $0x28] sm:$0xff] }
  0x3e   : > { %483 = vmatpush.bf16.msra.mxu0 %v1283_v1  ;;  %v1292_v13 = vld [vmem:[#allocation7 + $0x38] sm:$0xff]  ;;  %v1291_v15 = vld [vmem:[#allocation7 + $0x30] sm:$0xff]  ;;  %v1290_v16 = vld [vmem:[#allocation7 + $0x28] sm:$0xff] }
  0x3f   : > { %622 = vmatpush.bf16.msra.mxu1 %v1292_v13  ;;  %v1289_v17 = vld [vmem:[#allocation7 + $0x20] sm:$0xff]  ;;  %v1288_v18 = vld [vmem:[#allocation7 + $0x18] sm:$0xff]  ;;  %v1275_v19 = vld [vmem:[%s1759_s23 + $0x30] sm:$0xff] }
  0x40   : > { %v1287_v20 = vld [vmem:[#allocation7 + $0x10] sm:$0xff]  ;;  %v1286_v21 = vld [vmem:[#allocation7 + $0x8] sm:$0xff]  ;;  %v1285_v22 = vld [vmem:[#allocation7] sm:$0xff] }
  0x41   : > { %v1276_v23 = vld [vmem:[%s1759_s23 + $0x38] sm:$0xff]  ;;  %v383_v24 = vld [vmem:[%s1884_s2] sm:$0x1]  ;;  %s981_s23 = scalar_lea.hbm %s1889_s7, %s1309_s11 }
  0x42   : > { %484 = vmatpush.bf16.msra.mxu0 %v1282_v2  ;;  %v384_v25 = vunpack.c.l.bf16 %v383_v24  ;;  %v1300_v2 = vld [vmem:[#allocation7 + $0x78] sm:$0xff]  ;;  %s984_s12 = sshll.u32 %s981_s23, 4  ;;  %s985_s12 = int_to_ptr.hbm [resolvable:$true] %s984_s12 }
  0x43   : > { %623 = vmatpush.bf16.msra.mxu1 %v1291_v15  ;;  %764 = vmatpush.bf16.msra.mxu2 %v1300_v2  ;;  %v1296_v13 = vld [vmem:[#allocation7 + $0x58] sm:$0xff]  ;;  %s1525_s10 = sshra.s32 %s985_s12, 4  ;;  %s1526_s10 = int_to_ptr.hbm [resolvable:$true] %s1525_s10 }
  0x44   : > { %v1784_v27 = vperm.slane %v384_v25, 0  ;;  %s1527_s14 = scalar_lea.hbm %s1526_s10, 128  ;;  %p1532_p11 = scmp.lt.s32.totalorder %s1526_s10, %s1889_s7 }
  0x45   : > { %p1528_p1 = scmp.ne.s32.totalorder %s1526_s10, %s1527_s14  ;;  %p1533_p9 = scmp.lt.s32.totalorder %s1531_s22, %s1527_s14 }
  0x46   : > { %485 = vmatpush.bf16.msra.mxu0 %v1281_v3 }
  0x47   : > { %624 = vmatpush.bf16.msra.mxu1 %v1290_v16  ;;  %p1529_p4 = pnand %p1528_p1, %p1725_p3  ;;  %p1534_p2 = por %p1533_p9, %p1532_p11 }
  0x49   : > { %p1530_p8 = pneg %p1529_p4 }
  0x4a   : > { %486 = vmatpush.bf16.msra.mxu0 %v1280_v4 }
  0x4b   : > { %625 = vmatpush.bf16.msra.mxu1 %v1289_v17  ;;  %v1295_v17 = vld [vmem:[#allocation7 + $0x50] sm:$0xff]  ;;  %p1535_p10 = pnand %p1534_p2, %p1530_p8 }
  0x4e   : > { %487 = vmatpush.bf16.msra.mxu0 %v1279_v5 }
  0x4f   : > { %626 = vmatpush.bf16.msra.mxu1 %v1288_v18 }
  0x52   : > { %488 = vmatpush.bf16.msra.mxu0 %v1278_v6  ;;  %v1299_v6 = vld [vmem:[#allocation7 + $0x70] sm:$0xff] }
  0x53   : > { %627 = vmatpush.bf16.msra.mxu1 %v1287_v20  ;;  %765 = vmatpush.bf16.msra.mxu2 %v1299_v6  ;;  %v1293_v20 = vld [vmem:[#allocation7 + $0x40] sm:$0xff] }
  0x56   : > { %489 = vmatpush.bf16.msra.mxu0 %v1277_v7 }
  0x57   : > { %628 = vmatpush.bf16.msra.mxu1 %v1286_v21 }
  0x59   : > { %490 = vmatmul.bf16.vlgmr.msra.gmra.mxu0 %v1269_v8  ;;  %v1298_v8 = vld [vmem:[#allocation7 + $0x68] sm:$0xff] }
  0x5a   : > { %766 = vmatpush.bf16.msra.mxu2 %v1298_v8  ;;  %v1308_v8 = vld [vmem:[#allocation8 + $0x38] sm:$0xff] }
  0x5b   : > { %629 = vmatpush.bf16.msra.mxu1 %v1285_v22  ;;  %904 = vmatpush.bf16.msra.mxu3 %v1308_v8 }
  0x69   : > { %495 = vmatmul.bf16.gmra.mxu0 %v1270_v9  ;;  %v1297_v9 = vld [vmem:[#allocation7 + $0x60] sm:$0xff] }
  0x6a   : > { %767 = vmatpush.bf16.msra.mxu2 %v1297_v9 }
  0x6e   : > { %768 = vmatpush.bf16.msra.mxu2 %v1296_v13 }
  0x72   : > { %769 = vmatpush.bf16.msra.mxu2 %v1295_v17 }
  0x79   : > { %500 = vmatmul.bf16.gmra.mxu0 %v1271_v10 }
  0x89   : > { %505 = vmatmul.bf16.gmra.mxu0 %v1272_v11 }
  0x99   : > { %510 = vmatmul.bf16.gmra.mxu0 %v1273_v12 }
  0xa9   : > { %515 = vmatmul.bf16.gmra.mxu0 %v1274_v14 }
  0xb9   : > { %520 = vmatmul.bf16.gmra.mxu0 %v1275_v19  ;;  %v1294_v19 = vld [vmem:[#allocation7 + $0x48] sm:$0xff] }
  0xba   : > { %770 = vmatpush.bf16.msra.mxu2 %v1294_v19 }
  0xbe   : > { %771 = vmatpush.bf16.msra.mxu2 %v1293_v20  ;;  %v1304_v20 = vld [vmem:[#allocation8 + $0x18] sm:$0xff] }
  0xc9   : > { %525 = vmatmul.bf16.gmra.mxu0 %v1276_v23 }
  0xd6   : > { %v491_v26 = vpop.f32.mrf.mxu0 }
  0xd7   : > { %v492_v28 = vadd.f32 %v491_v26, %v1784_v27 }
  0xd9   : > { %v531_v31 = vmax.f32 %v492_v28, 0.0  ;;  %v563_v28 = vld [vmem:[%s1886_s4] sm:$0x1] }
  0xde   : > { %v493_v29 = vpop.f32.mrf.mxu0 }
  0xdf   : > { %v494_v30 = vadd.f32 %v493_v29, %v1784_v27  ;;  %v572_v29 = vunpack.c.l.bf16 %v563_v28 }
  0xe1   : > { %v532_v32 = vmax.f32 %v494_v30, 0.0 }
  0xe3   : > { %v564_v33 = vpack.c.bf16 %v532_v32, %v531_v31  ;;  %v1805_v31 = vperm.slane %v572_v29, 0  ;;  %v1301_v29 = vld [vmem:[#allocation8] sm:$0xff] }
  0xe5   : > { %630 = vmatmul.bf16.vlgmr.msra.gmra.mxu1 %v564_v33 }
  0xe6   : > { %v496_v34 = vpop.f32.mrf.mxu0 }
  0xe7   : > { %v497_v35 = vadd.f32 %v496_v34, %v1784_v27 }
  0xe9   : > { %v533_v38 = vmax.f32 %v497_v35, 0.0 }
  0xee   : > { %v498_v36 = vpop.f32.mrf.mxu0 }
  0xef   : > { %v499_v37 = vadd.f32 %v498_v36, %v1784_v27 }
  0xf1   : > { %v534_v39 = vmax.f32 %v499_v37, 0.0 }
  0xf3   : > { %v565_v40 = vpack.c.bf16 %v534_v39, %v533_v38 }
  0xf5   : > { %635 = vmatmul.bf16.gmra.mxu1 %v565_v40 }
  0xf6   : > { %v501_v41 = vpop.f32.mrf.mxu0 }
  0xf7   : > { %v502_v42 = vadd.f32 %v501_v41, %v1784_v27 }
  0xf9   : > { %v535_v45 = vmax.f32 %v502_v42, 0.0 }
  0xfe   : > { %v503_v43 = vpop.f32.mrf.mxu0 }
  0xff   : > { %v504_v44 = vadd.f32 %v503_v43, %v1784_v27 }
 0x101   : > { %v536_v46 = vmax.f32 %v504_v44, 0.0 }
 0x103   : > { %v566_v47 = vpack.c.bf16 %v536_v46, %v535_v45 }
 0x105   : > { %640 = vmatmul.bf16.gmra.mxu1 %v566_v47 }
 0x106   : > { %v506_v48 = vpop.f32.mrf.mxu0 }
 0x107   : > { %v507_v49 = vadd.f32 %v506_v48, %v1784_v27 }
 0x109   : > { %v537_v52 = vmax.f32 %v507_v49, 0.0 }
 0x10e   : > { %v508_v50 = vpop.f32.mrf.mxu0 }
 0x10f   : > { %v509_v51 = vadd.f32 %v508_v50, %v1784_v27 }
 0x111   : > { %v538_v53 = vmax.f32 %v509_v51, 0.0 }
 0x113   : > { %v567_v54 = vpack.c.bf16 %v538_v53, %v537_v52 }
 0x115   : > { %645 = vmatmul.bf16.gmra.mxu1 %v567_v54 }
 0x116   : > { %v511_v55 = vpop.f32.mrf.mxu0 }
 0x117   : > { %v512_v56 = vadd.f32 %v511_v55, %v1784_v27 }
 0x119   : > { %v539_v59 = vmax.f32 %v512_v56, 0.0 }
 0x11e   : > { %v513_v57 = vpop.f32.mrf.mxu0 }
 0x11f   : > { %v514_v58 = vadd.f32 %v513_v57, %v1784_v27 }
 0x121   : > { %v540_v60 = vmax.f32 %v514_v58, 0.0 }
 0x123   : > { %v568_v61 = vpack.c.bf16 %v540_v60, %v539_v59 }
 0x125   : > { %650 = vmatmul.bf16.gmra.mxu1 %v568_v61 }
 0x126   : > { %v516_v62 = vpop.f32.mrf.mxu0 }
 0x127   : > { %v517_v63 = vadd.f32 %v516_v62, %v1784_v27 }
 0x129   : > { %v541_v3 = vmax.f32 %v517_v63, 0.0 }
 0x12e   : > { %v518_v0 = vpop.f32.mrf.mxu0 }
 0x12f   : > { %v519_v1 = vadd.f32 %v518_v0, %v1784_v27 }
 0x131   : > { %v542_v4 = vmax.f32 %v519_v1, 0.0 }
 0x133   : > { %v569_v5 = vpack.c.bf16 %v542_v4, %v541_v3 }
 0x135   : > { %655 = vmatmul.bf16.gmra.mxu1 %v569_v5 }
 0x136   : > { %v521_v7 = vpop.f32.mrf.mxu0 }
 0x137   : > { %v522_v10 = vadd.f32 %v521_v7, %v1784_v27 }
 0x139   : > { %v543_v14 = vmax.f32 %v522_v10, 0.0  ;;  %v1307_v10 = vld [vmem:[#allocation8 + $0x30] sm:$0xff] }
 0x13a   : > { %905 = vmatpush.bf16.msra.mxu3 %v1307_v10 }
 0x13e   : > { %v523_v11 = vpop.f32.mrf.mxu0 }
 0x13f   : > { %v524_v12 = vadd.f32 %v523_v11, %v1784_v27  ;;  %v1306_v11 = vld [vmem:[#allocation8 + $0x28] sm:$0xff] }
 0x140   : > { %906 = vmatpush.bf16.msra.mxu3 %v1306_v11 }
 0x141   : > { %v544_v15 = vmax.f32 %v524_v12, 0.0 }
 0x143   : > { %v570_v16 = vpack.c.bf16 %v544_v15, %v543_v14  ;;  %v1305_v15 = vld [vmem:[#allocation8 + $0x20] sm:$0xff] }
 0x144   : > { %907 = vmatpush.bf16.msra.mxu3 %v1305_v15 }
 0x145   : > { %660 = vmatmul.bf16.gmra.mxu1 %v570_v16 }
 0x146   : > { %v526_v18 = vpop.f32.mrf.mxu0 }
 0x147   : > { %v527_v21 = vadd.f32 %v526_v18, %v1784_v27 }
 0x148   : > { %908 = vmatpush.bf16.msra.mxu3 %v1304_v20 }
 0x149   : > { %v545_v24 = vmax.f32 %v527_v21, 0.0  ;;  %v1303_v21 = vld [vmem:[#allocation8 + $0x10] sm:$0xff] }
 0x14c   : > { %909 = vmatpush.bf16.msra.mxu3 %v1303_v21 }
 0x14e   : > { %v528_v22 = vpop.f32.mrf.mxu0 }
 0x14f   : > { %v529_v23 = vadd.f32 %v528_v22, %v1784_v27 }
 0x151   : > { %v546_v25 = vmax.f32 %v529_v23, 0.0 }
 0x153   : > { %v571_v26 = vpack.c.bf16 %v546_v25, %v545_v24  ;;  %v1302_v24 = vld [vmem:[#allocation8 + $0x8] sm:$0xff] }
 0x154   : > { %910 = vmatpush.bf16.msra.mxu3 %v1302_v24 }
 0x155   : > { %665 = vmatmul.bf16.gmra.mxu1 %v571_v26 }
 0x158   : > { %911 = vmatpush.bf16.msra.mxu3 %v1301_v29 }
 0x162   : > { %v631_v30 = vpop.f32.mrf.mxu1 }
 0x163   : > { %v632_v32 = vadd.f32 %v631_v30, %v1805_v31 }
 0x165   : > { %v671_v35 = vmax.f32 %v632_v32, 0.0  ;;  %v1198_v32 = vld [vmem:[%s1886_s4 + $0x1] sm:$0x1] }
 0x16a   : > { %v633_v33 = vpop.f32.mrf.mxu1 }
 0x16b   : > { %v634_v34 = vadd.f32 %v633_v33, %v1805_v31  ;;  %v714_v33 = vunpack.c.l.bf16 %v1198_v32 }
 0x16d   : > { %v672_v36 = vmax.f32 %v634_v34, 0.0 }
 0x16f   : > { %v706_v27 = vpack.c.bf16 %v672_v36, %v671_v35  ;;  %v715_v35 = vperm.slane %v714_v33, 0 }
 0x171   : > { %772 = vmatmul.bf16.vlgmr.msra.gmra.mxu2 %v706_v27 }
 0x172   : > { %v636_v37 = vpop.f32.mrf.mxu1 }
 0x173   : > { %v637_v38 = vadd.f32 %v636_v37, %v1805_v31 }
 0x175   : > { %v673_v41 = vmax.f32 %v637_v38, 0.0 }
 0x17a   : > { %v638_v39 = vpop.f32.mrf.mxu1 }
 0x17b   : > { %v639_v40 = vadd.f32 %v638_v39, %v1805_v31 }
 0x17d   : > { %v674_v42 = vmax.f32 %v639_v40, 0.0 }
 0x17f   : > { %v707_v43 = vpack.c.bf16 %v674_v42, %v673_v41 }
 0x181   : > { %777 = vmatmul.bf16.gmra.mxu2 %v707_v43 }
 0x182   : > { %v641_v44 = vpop.f32.mrf.mxu1 }
 0x183   : > { %v642_v45 = vadd.f32 %v641_v44, %v1805_v31 }
 0x185   : > { %v675_v48 = vmax.f32 %v642_v45, 0.0 }
 0x18a   : > { %v643_v46 = vpop.f32.mrf.mxu1 }
 0x18b   : > { %v644_v47 = vadd.f32 %v643_v46, %v1805_v31 }
 0x18d   : > { %v676_v49 = vmax.f32 %v644_v47, 0.0 }
 0x18f   : > { %v708_v50 = vpack.c.bf16 %v676_v49, %v675_v48 }
 0x191   : > { %782 = vmatmul.bf16.gmra.mxu2 %v708_v50 }
 0x192   : > { %v646_v51 = vpop.f32.mrf.mxu1 }
 0x193   : > { %v647_v52 = vadd.f32 %v646_v51, %v1805_v31 }
 0x195   : > { %v677_v55 = vmax.f32 %v647_v52, 0.0 }
 0x19a   : > { %v648_v53 = vpop.f32.mrf.mxu1 }
 0x19b   : > { %v649_v54 = vadd.f32 %v648_v53, %v1805_v31 }
 0x19d   : > { %v678_v56 = vmax.f32 %v649_v54, 0.0 }
 0x19f   : > { %v709_v57 = vpack.c.bf16 %v678_v56, %v677_v55 }
 0x1a1   : > { %787 = vmatmul.bf16.gmra.mxu2 %v709_v57 }
 0x1a2   : > { %v651_v58 = vpop.f32.mrf.mxu1 }
 0x1a3   : > { %v652_v59 = vadd.f32 %v651_v58, %v1805_v31 }
 0x1a5   : > { %v679_v62 = vmax.f32 %v652_v59, 0.0 }
 0x1aa   : > { %v653_v60 = vpop.f32.mrf.mxu1 }
 0x1ab   : > { %v654_v61 = vadd.f32 %v653_v60, %v1805_v31 }
 0x1ad   : > { %v680_v63 = vmax.f32 %v654_v61, 0.0 }
 0x1af   : > { %v710_v0 = vpack.c.bf16 %v680_v63, %v679_v62 }
 0x1b1   : > { %792 = vmatmul.bf16.gmra.mxu2 %v710_v0 }
 0x1b2   : > { %v656_v1 = vpop.f32.mrf.mxu1 }
 0x1b3   : > { %v657_v2 = vadd.f32 %v656_v1, %v1805_v31 }
 0x1b5   : > { %v681_v5 = vmax.f32 %v657_v2, 0.0 }
 0x1ba   : > { %v658_v3 = vpop.f32.mrf.mxu1 }
 0x1bb   : > { %v659_v4 = vadd.f32 %v658_v3, %v1805_v31 }
 0x1bd   : > { %v682_v6 = vmax.f32 %v659_v4, 0.0 }
 0x1bf   : > { %v711_v7 = vpack.c.bf16 %v682_v6, %v681_v5 }
 0x1c1   : > { %797 = vmatmul.bf16.gmra.mxu2 %v711_v7 }
 0x1c2   : > { %v661_v9 = vpop.f32.mrf.mxu1 }
 0x1c3   : > { %v662_v12 = vadd.f32 %v661_v9, %v1805_v31 }
 0x1c5   : > { %v683_v16 = vmax.f32 %v662_v12, 0.0 }
 0x1ca   : > { %v663_v13 = vpop.f32.mrf.mxu1 }
 0x1cb   : > { %v664_v14 = vadd.f32 %v663_v13, %v1805_v31 }
 0x1cd   : > { %v684_v17 = vmax.f32 %v664_v14, 0.0 }
 0x1cf   : > { %v712_v18 = vpack.c.bf16 %v684_v17, %v683_v16 }
 0x1d1   : > { %802 = vmatmul.bf16.gmra.mxu2 %v712_v18 }
 0x1d2   : > { %v666_v19 = vpop.f32.mrf.mxu1 }
 0x1d3   : > { %v667_v22 = vadd.f32 %v666_v19, %v1805_v31 }
 0x1d5   : > { %v685_v26 = vmax.f32 %v667_v22, 0.0 }
 0x1da   : > { %v668_v23 = vpop.f32.mrf.mxu1 }
 0x1db   : > { %v669_v25 = vadd.f32 %v668_v23, %v1805_v31 }
 0x1dd   : > { %v686_v28 = vmax.f32 %v669_v25, 0.0  ;;  %v853_v25 = vld [vmem:[%s1888_s6] sm:$0x1] }
 0x1df   : > { %v713_v30 = vpack.c.bf16 %v686_v28, %v685_v26  ;;  %v854_v26 = vunpack.c.l.bf16 %v853_v25 }
 0x1e1   : > { %807 = vmatmul.bf16.gmra.mxu2 %v713_v30  ;;  %v855_v28 = vperm.slane %v854_v26, 0 }
 0x1f4   : > { %v773_v34 = vpop.f32.mrf.mxu2 }
 0x1f5   : > { %v774_v36 = vadd.f32 %v773_v34, %v715_v35 }
 0x1f7   : > { %v813_v38 = vmax.f32 %v774_v36, 0.0 }
 0x1fc   : > { %v775_v27 = vpop.f32.mrf.mxu2 }
 0x1fd   : > { %v776_v37 = vadd.f32 %v775_v27, %v715_v35 }
 0x1ff   : > { %v814_v39 = vmax.f32 %v776_v37, 0.0 }
 0x201   : > { %v829_v31 = vpack.c.bf16 %v814_v39, %v813_v38 }
 0x203   : > { %912 = vmatmul.bf16.vlgmr.msra.gmra.mxu3 %v829_v31 }
 0x204   : > { %v778_v40 = vpop.f32.mrf.mxu2 }
 0x205   : > { %v779_v41 = vadd.f32 %v778_v40, %v715_v35 }
 0x207   : > { %v815_v44 = vmax.f32 %v779_v41, 0.0 }
 0x20c   : > { %v780_v42 = vpop.f32.mrf.mxu2 }
 0x20d   : > { %v781_v43 = vadd.f32 %v780_v42, %v715_v35 }
 0x20f   : > { %v816_v45 = vmax.f32 %v781_v43, 0.0 }
 0x211   : > { %v830_v46 = vpack.c.bf16 %v816_v45, %v815_v44 }
 0x213   : > { %917 = vmatmul.bf16.gmra.mxu3 %v830_v46 }
 0x214   : > { %v783_v47 = vpop.f32.mrf.mxu2 }
 0x215   : > { %v784_v48 = vadd.f32 %v783_v47, %v715_v35 }
 0x217   : > { %v817_v51 = vmax.f32 %v784_v48, 0.0 }
 0x21c   : > { %v785_v49 = vpop.f32.mrf.mxu2 }
 0x21d   : > { %v786_v50 = vadd.f32 %v785_v49, %v715_v35 }
 0x21f   : > { %v818_v52 = vmax.f32 %v786_v50, 0.0 }
 0x221   : > { %v831_v53 = vpack.c.bf16 %v818_v52, %v817_v51 }
 0x223   : > { %922 = vmatmul.bf16.gmra.mxu3 %v831_v53 }
 0x224   : > { %v788_v54 = vpop.f32.mrf.mxu2 }
 0x225   : > { %v789_v55 = vadd.f32 %v788_v54, %v715_v35 }
 0x227   : > { %v819_v58 = vmax.f32 %v789_v55, 0.0 }
 0x22c   : > { %v790_v56 = vpop.f32.mrf.mxu2 }
 0x22d   : > { %v791_v57 = vadd.f32 %v790_v56, %v715_v35 }
 0x22f   : > { %v820_v59 = vmax.f32 %v791_v57, 0.0 }
 0x231   : > { %v832_v60 = vpack.c.bf16 %v820_v59, %v819_v58 }
 0x233   : > { %927 = vmatmul.bf16.gmra.mxu3 %v832_v60 }
 0x234   : > { %v793_v61 = vpop.f32.mrf.mxu2 }
 0x235   : > { %v794_v62 = vadd.f32 %v793_v61, %v715_v35 }
 0x237   : > { %v821_v1 = vmax.f32 %v794_v62, 0.0 }
 0x23c   : > { %v795_v63 = vpop.f32.mrf.mxu2 }
 0x23d   : > { %v796_v0 = vadd.f32 %v795_v63, %v715_v35 }
 0x23f   : > { %v822_v2 = vmax.f32 %v796_v0, 0.0 }
 0x241   : > { %v833_v3 = vpack.c.bf16 %v822_v2, %v821_v1 }
 0x243   : > { %932 = vmatmul.bf16.gmra.mxu3 %v833_v3 }
 0x244   : > { %v798_v4 = vpop.f32.mrf.mxu2 }
 0x245   : > { %v799_v5 = vadd.f32 %v798_v4, %v715_v35 }
 0x247   : > { %v823_v8 = vmax.f32 %v799_v5, 0.0 }
 0x24c   : > { %v800_v6 = vpop.f32.mrf.mxu2 }
 0x24d   : > { %v801_v7 = vadd.f32 %v800_v6, %v715_v35 }
 0x24f   : > { %v824_v9 = vmax.f32 %v801_v7, 0.0 }
 0x251   : > { %v834_v10 = vpack.c.bf16 %v824_v9, %v823_v8 }
 0x253   : > { %937 = vmatmul.bf16.gmra.mxu3 %v834_v10 }
 0x254   : > { %v803_v11 = vpop.f32.mrf.mxu2 }
 0x255   : > { %v804_v12 = vadd.f32 %v803_v11, %v715_v35 }
 0x257   : > { %v825_v15 = vmax.f32 %v804_v12, 0.0 }
 0x25c   : > { %v805_v13 = vpop.f32.mrf.mxu2 }
 0x25d   : > { %v806_v14 = vadd.f32 %v805_v13, %v715_v35 }
 0x25f   : > { %v826_v16 = vmax.f32 %v806_v14, 0.0 }
 0x261   : > { %v835_v17 = vpack.c.bf16 %v826_v16, %v825_v15 }
 0x263   : > { %942 = vmatmul.bf16.gmra.mxu3 %v835_v17 }
 0x264   : > { %v808_v18 = vpop.f32.mrf.mxu2 }
 0x265   : > { %v809_v19 = vadd.f32 %v808_v18, %v715_v35 }
 0x267   : > { %v827_v22 = vmax.f32 %v809_v19, 0.0 }
 0x26c   : > { %v810_v20 = vpop.f32.mrf.mxu2 }
 0x26d   : > { %v811_v21 = vadd.f32 %v810_v20, %v715_v35 }
 0x26f   : > { %v828_v23 = vmax.f32 %v811_v21, 0.0 }
 0x271   : > { %v836_v24 = vpack.c.bf16 %v828_v23, %v827_v22 }
 0x273   : > { %947 = vmatmul.bf16.gmra.mxu3 %v836_v24 }
 0x286   : > { %v913_v29 = vpop.f32.mrf.mxu3 }
 0x287   : > { %v914_v30 = vadd.f32 %v913_v29, %v855_v28 }
 0x289   : > { %953 = vst [vmem:[%s1830_s21] sm:$0xff] %v914_v30 }
 0x28e   : > { %v915_v32 = vpop.f32.mrf.mxu3 }
 0x28f   : > { %v916_v33 = vadd.f32 %v915_v32, %v855_v28 }
 0x291   : > { %954 = vst [vmem:[%s1830_s21 + $0x8] sm:$0xff] %v916_v33 }
 0x296   : > { %v918_v34 = vpop.f32.mrf.mxu3 }
 0x297   : > { %v919_v35 = vadd.f32 %v918_v34, %v855_v28 }
 0x299   : > { %955 = vst [vmem:[%s1830_s21 + $0x10] sm:$0xff] %v919_v35 }
 0x29e   : > { %v920_v36 = vpop.f32.mrf.mxu3 }
 0x29f   : > { %v921_v27 = vadd.f32 %v920_v36, %v855_v28 }
 0x2a1   : > { %956 = vst [vmem:[%s1830_s21 + $0x18] sm:$0xff] %v921_v27 }
 0x2a6   : > { %v923_v37 = vpop.f32.mrf.mxu3 }
 0x2a7   : > { %v924_v38 = vadd.f32 %v923_v37, %v855_v28 }
 0x2a9   : > { %957 = vst [vmem:[%s1830_s21 + $0x20] sm:$0xff] %v924_v38 }
 0x2ae   : > { %v925_v39 = vpop.f32.mrf.mxu3 }
 0x2af   : > { %v926_v31 = vadd.f32 %v925_v39, %v855_v28 }
 0x2b1   : > { %958 = vst [vmem:[%s1830_s21 + $0x28] sm:$0xff] %v926_v31 }
 0x2b6   : > { %v928_v40 = vpop.f32.mrf.mxu3 }
 0x2b7   : > { %v929_v41 = vadd.f32 %v928_v40, %v855_v28 }
 0x2b9   : > { %959 = vst [vmem:[%s1830_s21 + $0x30] sm:$0xff] %v929_v41 }
 0x2be   : > { %v930_v42 = vpop.f32.mrf.mxu3 }
 0x2bf   : > { %v931_v43 = vadd.f32 %v930_v42, %v855_v28 }
 0x2c1   : > { %960 = vst [vmem:[%s1830_s21 + $0x38] sm:$0xff] %v931_v43 }
 0x2c6   : > { %v933_v44 = vpop.f32.mrf.mxu3 }
 0x2c7   : > { %v934_v45 = vadd.f32 %v933_v44, %v855_v28 }
 0x2c9   : > { %961 = vst [vmem:[%s1830_s21 + $0x40] sm:$0xff] %v934_v45 }
 0x2ce   : > { %v935_v46 = vpop.f32.mrf.mxu3 }
 0x2cf   : > { %v936_v47 = vadd.f32 %v935_v46, %v855_v28 }
 0x2d1   : > { %962 = vst [vmem:[%s1830_s21 + $0x48] sm:$0xff] %v936_v47 }
 0x2d6   : > { %v938_v48 = vpop.f32.mrf.mxu3 }
 0x2d7   : > { %v939_v49 = vadd.f32 %v938_v48, %v855_v28 }
 0x2d9   : > { %963 = vst [vmem:[%s1830_s21 + $0x50] sm:$0xff] %v939_v49 }
 0x2de   : > { %v940_v50 = vpop.f32.mrf.mxu3 }
 0x2df   : > { %v941_v51 = vadd.f32 %v940_v50, %v855_v28 }
 0x2e1   : > { %964 = vst [vmem:[%s1830_s21 + $0x58] sm:$0xff] %v941_v51 }
 0x2e6   : > { %v943_v52 = vpop.f32.mrf.mxu3 }
 0x2e7   : > { %v944_v53 = vadd.f32 %v943_v52, %v855_v28 }
 0x2e9   : > { %965 = vst [vmem:[%s1830_s21 + $0x60] sm:$0xff] %v944_v53 }
 0x2ee   : > { %v945_v54 = vpop.f32.mrf.mxu3 }
 0x2ef   : > { %v946_v55 = vadd.f32 %v945_v54, %v855_v28 }
 0x2f1   : > { %966 = vst [vmem:[%s1830_s21 + $0x68] sm:$0xff] %v946_v55 }
 0x2f6   : > { %v948_v56 = vpop.f32.mrf.mxu3 }
 0x2f7   : > { %v949_v57 = vadd.f32 %v948_v56, %v855_v28 }
 0x2f9   : > { %967 = vst [vmem:[%s1830_s21 + $0x70] sm:$0xff] %v949_v57 }
 0x2fe   : > { %v950_v58 = vpop.f32.mrf.mxu3 }
 0x2ff   : > { %v951_v59 = vadd.f32 %v950_v58, %v855_v28 }
 0x301   : > { %968 = vst [vmem:[%s1830_s21 + $0x78] sm:$0xff] %v951_v59 }
 0x302   : > { %1538 = shalt.err (!%p1535_p10)
}
 0x303   : > { %s1592_s15 = smov 128   ;;  %s1593_s21 = smov 8  }
 0x304   : > { %1324 = dma.vmem_to_hbm [thread:$0]  (%p1725_p3), %s983_s30, 2048, %s985_s12, %s970_s19, %s1592_s15, %s1592_s15, %s1593_s21  }
 0x305 PF: > { %s999_s11 = sand.u32 1, %s1573_s24   ;;  %p1902_p12 = scmp.ge.s32.totalorder %s1585_s27, 2 }
 0x306   : > { %s1000_s20 = scalar_lea.sflag [#allocation4], %s999_s11 }
 0x307   : > { %p1341_p13 = pnand %p1902_p12, %p1669_p6 }
 0x309   : > { %p1342_p0 = pneg %p1341_p13 }
 0x30b   : > { %1568 = dma.done.wait (%p1342_p0), %s1000_s20, 2048  }
 0x30c   : > { %1570 = vsyncadd (%p1342_p0), %s1000_s20, 4294965248  ;;  %p22_p5 = scmp.ge.s32.totalorder %s1707_s13, 4   ;;  %s1903_s24 = smov %s1577_s25 }
 0x30d   : > { %s1904_s25 = smov %s1581_s26  ;;  %s1905_s26 = smov %s1721_s17 }
 0x30e   : > { %s1906_s27 = smov %s1707_s13  ;;  %24 = sbr.rel (!%p22_p5) target bundleno = 9 (0x9), region = 107 }
 0x313   :  { %1006 = vsyncpa [#allocation3], 1 }
 0x314   :  { %1008 = vsyncpa [#allocation3 + $0x1], 1 }
 0x315   :  { %1009 = vsyncpa [#allocation6], 1 }
 0x316   :  { %1010 = vsyncpa [#allocation9], 1 }
 0x317   :  { %1011 = vsyncpa [#allocation4], 1 }
 0x318   :  { %1013 = vsyncpa [#allocation4 + $0x1], 1 }

</bundles_post_ra>
